<compile_context>
chip_gen: v5e
topology: v5e:2x2
jax: 0.10.0
libtpu: 0.0.40
codegen_flags: <defaults>
</compile_context>

<pallas_src>
import functools

import jax
import jax.numpy as jnp
from jax import lax
from jax.experimental import pallas as pl
from jax.experimental.pallas import tpu as pltpu

NEG_SLOPE = 0.01  # torch.nn.LeakyReLU / F.leaky_relu default negative_slope


def _leaky_relu(x):
    return jnp.where(x >= 0, x, NEG_SLOPE * x)


def _banded_conv_weights(w_oihw, W):
    """OIHW (Cout, Cin, 3, 3) -> (3, W*Cin, W*Cout) banded matrices (one per kh).

    banded[kh, w_in*Cin + ci, w_out*Cout + co] = w[co, ci, kh, w_in - w_out + 1]
    when |w_in - w_out| <= 1, else 0.  Multiplying a row laid out as (w, ci) by
    banded[kh] performs the kw-sum (and the 'SAME' zero padding along W) of a
    3x3 convolution for vertical tap kh.
    """
    Cout, Cin, KH, KW = w_oihw.shape
    w_hwio = jnp.transpose(w_oihw, (2, 3, 1, 0))              # (3, 3, Cin, Cout)
    win = jnp.arange(W)[:, None]
    wout = jnp.arange(W)[None, :]
    kw = win - wout + 1                                       # (W, W)
    valid = (kw >= 0) & (kw <= 2)
    blocks = w_hwio[:, jnp.clip(kw, 0, 2)]                    # (3, W, W, Cin, Cout)
    blocks = jnp.where(valid[None, :, :, None, None], blocks, 0.0)
    banded = jnp.transpose(blocks, (0, 1, 3, 2, 4))           # (3, W, Cin, W, Cout)
    return banded.reshape(KH, W * Cin, W * Cout)


def prepare_weights(w1_oihw, w2_oihw, W):
    """Once-per-weight-update preparation (NOT per forward call).

    Builds the K-stacked banded bf16 weights of shape (3*W*C, W*C), row blocks
    ordered [kh=0; kh=1; kh=2] to match the in-kernel concat [x(h-1), x(h), x(h+1)].
    Cache the result and reuse it across forward calls.
    """
    def stack(w_oihw):
        banded = _banded_conv_weights(w_oihw, W)              # (3, WC, WC)
        KH, wc_in, wc_out = banded.shape
        return banded.reshape(KH * wc_in, wc_out).astype(jnp.bfloat16)
    return stack(w1_oihw), stack(w2_oihw)


def resnet_block_kernel(x_ref, w1_ref, w2_ref, o_ref, *, H):
    # x_ref : (R, WC)      f32   rows r = n*H + h, lanes = w*C + c
    # w*_ref: (3*WC, WC)   bf16  K-stacked banded weights [kh=0; kh=1; kh=2]
    # o_ref : (R, WC)      f32
    R, WC = x_ref.shape
    x = x_ref[...]

    # h-boundary masks for the vertical taps (zero padding along H; batch
    # boundaries coincide with h boundaries so the same mask handles both).
    h_idx = lax.broadcasted_iota(jnp.int32, (R, 1), 0) % H
    not_top = h_idx > 0          # rows with h == 0 have no h-1 neighbor
    not_bot = h_idx < H - 1      # rows with h == H-1 have no h+1 neighbor

    def conv3x3(v, w_ref):
        # Vertical taps via XLU roll + VPU mask (exact 0/1 permutation),
        # then ONE bf16 MXU matmul with K = 3*WC, f32 accumulation.
        v_dn = jnp.where(not_top, pltpu.roll(v, shift=1, axis=0), 0.0)      # v[r-1]
        v_up = jnp.where(not_bot, pltpu.roll(v, shift=R - 1, axis=0), 0.0)  # v[r+1]
        xcat = jnp.concatenate([v_dn, v, v_up], axis=1).astype(jnp.bfloat16)
        return jnp.dot(xcat, w_ref[...], preferred_element_type=jnp.float32)

    h1 = _leaky_relu(conv3x3(x, w1_ref))
    out = _leaky_relu(conv3x3(h1, w2_ref) + x)   # residual add in f32
    o_ref[...] = out.astype(o_ref.dtype)


def resnet_block(x_nchw, w1_stacked, w2_stacked):
    """Forward pass of ResNetBlock.

    x: (N, C, H, W) f32; w*_stacked: (3*W*C, W*C) bf16 from prepare_weights().
    """
    N, C, H, W = x_nchw.shape
    R, WC = N * H, W * C
    assert R % 8 == 0 and WC % 128 == 0, (R, WC)
    assert w1_stacked.shape == (3 * WC, WC) and w2_stacked.shape == (3 * WC, WC)

    # (N, C, H, W) -> rows = (n, h), lanes = w*C + c  (lane-dense: WC = 256 here).
    x2 = jnp.transpose(x_nchw, (0, 2, 3, 1)).reshape(R, WC)

    # Whole batch in a single grid step: at these sizes per-step overhead
    # dominates and M = N*H feeds the MXU better.  See scaling notes above for
    # how to block the row axis at larger N*H.
    out2 = pl.pallas_call(
        functools.partial(resnet_block_kernel, H=H),
        out_shape=jax.ShapeDtypeStruct((R, WC), x_nchw.dtype),
        grid_spec=pltpu.PrefetchScalarGridSpec(
            num_scalar_prefetch=0,
            grid=(1,),
            in_specs=[
                pl.BlockSpec((R, WC), lambda i: (0, 0)),
                pl.BlockSpec((3 * WC, WC), lambda i: (0, 0)),
                pl.BlockSpec((3 * WC, WC), lambda i: (0, 0)),
            ],
            out_specs=pl.BlockSpec((R, WC), lambda i: (0, 0)),
        ),
        compiler_params=pltpu.CompilerParams(
            dimension_semantics=("arbitrary",)),
    )(x2, w1_stacked, w2_stacked)

    out = out2.reshape(N, H, W, C)
    return jnp.transpose(out, (0, 3, 1, 2))                    # back to NCHW


def ref_forward(x_nchw, w1_oihw, w2_oihw):
    """Pure-JAX f32 reference matching the PyTorch forward (bias=False convs)."""
    dn = ("NCHW", "OIHW", "NCHW")
    y = lax.conv_general_dilated(x_nchw, w1_oihw, (1, 1), "SAME",
                                 dimension_numbers=dn)
    y = _leaky_relu(y)
    y = lax.conv_general_dilated(y, w2_oihw, (1, 1), "SAME",
                                 dimension_numbers=dn)
    y = y + x_nchw
    return _leaky_relu(y)


if __name__ == "__main__":
    key = jax.random.PRNGKey(0)
    k_x, k_w1, k_w2 = jax.random.split(key, 3)

    # num_filters=32, small spatial/batch
    N, C, H, W = 2, 32, 8, 8
    x = jax.random.normal(k_x, (N, C, H, W), jnp.float32)

    # Kaiming-uniform-style init (matches nn.Conv2d weight shape (C, C, 3, 3))
    fan_in = C * 3 * 3
    bound = 1.0 / (fan_in ** 0.5)
    w1 = jax.random.uniform(k_w1, (C, C, 3, 3), jnp.float32, -bound, bound)
    w2 = jax.random.uniform(k_w2, (C, C, 3, 3), jnp.float32, -bound, bound)

    # Weight prep is hoisted out of the forward path: done once per weight
    # update, reused for every subsequent forward call.
    w1s, w2s = prepare_weights(w1, w2, W)
    w1s, w2s = jax.block_until_ready((w1s, w2s))

    out = resnet_block(x, w1s, w2s)
    jax.block_until_ready(out)

    ref = ref_forward(x, w1, w2)
    assert out.shape == (N, C, H, W) and out.dtype == jnp.float32
    # bf16 MXU inputs (f32 accumulation) -> tolerance looser than pure f32.
    assert jnp.allclose(out, ref, atol=5e-2, rtol=5e-2), float(
        jnp.max(jnp.abs(out - ref)))

    print("KERNEL_OK")
</pallas_src>

<mosaic_0001>
module attributes {stable_mosaic.version = 11 : i64} {
  func.func @resnet_block_kernel(%arg0: i32, %arg1: memref<16x256xf32, #tpu.memory_space<vmem>>, %arg2: memref<768x256xbf16, #tpu.memory_space<vmem>>, %arg3: memref<768x256xbf16, #tpu.memory_space<vmem>>, %arg4: memref<16x256xf32, #tpu.memory_space<vmem>>) attributes {dimension_semantics = [#tpu.dimension_semantics<arbitrary>], iteration_bounds = array<i64: 1>, scalar_prefetch = 0 : i64, scratch_operands = 0 : i64, tpu.core_type = #tpu.core_type<tc>, window_params = [{pipeline_mode = #tpu.pipeline_mode<synchronous>, transform_indices = @transform_0, window_bounds = array<i64: 16, 256>}, {pipeline_mode = #tpu.pipeline_mode<synchronous>, transform_indices = @transform_1, window_bounds = array<i64: 768, 256>}, {pipeline_mode = #tpu.pipeline_mode<synchronous>, transform_indices = @transform_2, window_bounds = array<i64: 768, 256>}, {pipeline_mode = #tpu.pipeline_mode<synchronous>, transform_indices = @transform_3, window_bounds = array<i64: 16, 256>}]} {
    %c0 = arith.constant 0 : index
    %c0_0 = arith.constant 0 : index
    %0 = vector.load %arg1[%c0, %c0_0] : memref<16x256xf32, #tpu.memory_space<vmem>>, vector<16x256xf32>
    %1 = tpu.iota {dimensions = array<i32: 0>} : vector<16x1xi32>
    %c8_i32 = arith.constant 8 : i32
    %c0_i32 = arith.constant 0 : i32
    %2 = arith.cmpi eq, %c8_i32, %c0_i32 : i32
    %c1_i32 = arith.constant 1 : i32
    %3 = arith.select %2, %c1_i32, %c8_i32 : i32
    %4 = vector.broadcast %3 : i32 to vector<16x1xi32>
    %5 = arith.remsi %1, %4 : vector<16x1xi32>
    %c0_i32_1 = arith.constant 0 : i32
    %6 = vector.broadcast %c0_i32_1 : i32 to vector<16x1xi32>
    %7 = arith.cmpi ne, %5, %6 : vector<16x1xi32>
    %c0_i32_2 = arith.constant 0 : i32
    %8 = vector.broadcast %c0_i32_2 : i32 to vector<16x1xi32>
    %9 = arith.cmpi slt, %5, %8 : vector<16x1xi32>
    %c0_i32_3 = arith.constant 0 : i32
    %10 = arith.cmpi slt, %3, %c0_i32_3 : i32
    %11 = vector.broadcast %10 : i1 to vector<16x1xi1>
    %12 = vector.broadcast %11 : vector<16x1xi1> to vector<16x1xi1>
    %13 = arith.xori %9, %12 : vector<16x1xi1>
    %14 = arith.andi %13, %7 : vector<16x1xi1>
    %15 = vector.broadcast %3 : i32 to vector<16x1xi32>
    %16 = arith.addi %5, %15 : vector<16x1xi32>
    %17 = arith.select %14, %16, %5 : vector<16x1xi1>, vector<16x1xi32>
    %c0_i32_4 = arith.constant 0 : i32
    %18 = vector.broadcast %c0_i32_4 : i32 to vector<16x1xi32>
    %19 = arith.cmpi sgt, %17, %18 : vector<16x1xi32>
    %c7_i32 = arith.constant 7 : i32
    %20 = vector.broadcast %c7_i32 : i32 to vector<16x1xi32>
    %21 = arith.cmpi slt, %17, %20 : vector<16x1xi32>
    %c1_i32_5 = arith.constant 1 : i32
    %22 = tpu.dynamic_rotate %0 by %c1_i32_5 dim 0 : vector<16x256xf32>, i32 -> vector<16x256xf32>
    %cst = arith.constant 0.000000e+00 : f32
    %23 = vector.shape_cast %19 : vector<16x1xi1> to vector<16x1xi1>
    %24 = vector.broadcast %23 : vector<16x1xi1> to vector<16x256xi1>
    %25 = vector.broadcast %cst : f32 to vector<16x256xf32>
    %26 = arith.select %24, %22, %25 : vector<16x256xi1>, vector<16x256xf32>
    %c15_i32 = arith.constant 15 : i32
    %27 = tpu.dynamic_rotate %0 by %c15_i32 dim 0 : vector<16x256xf32>, i32 -> vector<16x256xf32>
    %cst_6 = arith.constant 0.000000e+00 : f32
    %28 = vector.shape_cast %21 : vector<16x1xi1> to vector<16x1xi1>
    %29 = vector.broadcast %28 : vector<16x1xi1> to vector<16x256xi1>
    %30 = vector.broadcast %cst_6 : f32 to vector<16x256xf32>
    %31 = arith.select %29, %27, %30 : vector<16x256xi1>, vector<16x256xf32>
    %32 = tpu.concatenate %26, %0, %31 in 1 : vector<16x256xf32>, vector<16x256xf32>, vector<16x256xf32> -> vector<16x768xf32>
    %33 = arith.truncf %32 : vector<16x768xf32> to vector<16x768xbf16>
    %c0_7 = arith.constant 0 : index
    %c0_8 = arith.constant 0 : index
    %34 = vector.load %arg2[%c0_7, %c0_8] : memref<768x256xbf16, #tpu.memory_space<vmem>>, vector<768x256xbf16>
    %cst_9 = arith.constant dense<0.000000e+00> : vector<16x256xf32>
    %35 = tpu.matmul %33, %34, %cst_9 {dimension_numbers = #tpu.dot_dimension_numbers<[1], [0], [0], [1], [0, 0, 1, 1], [], []>} : vector<16x768xbf16>, vector<768x256xbf16>, vector<16x256xf32> -> vector<16x256xf32>
    %cst_10 = arith.constant 0.000000e+00 : f32
    %36 = vector.broadcast %cst_10 : f32 to vector<16x256xf32>
    %37 = arith.cmpf oge, %35, %36 : vector<16x256xf32>
    %cst_11 = arith.constant 0.00999999977 : f32
    %38 = vector.broadcast %cst_11 : f32 to vector<16x256xf32>
    %39 = arith.mulf %38, %35 : vector<16x256xf32>
    %40 = arith.select %37, %35, %39 : vector<16x256xi1>, vector<16x256xf32>
    %c1_i32_12 = arith.constant 1 : i32
    %41 = tpu.dynamic_rotate %40 by %c1_i32_12 dim 0 : vector<16x256xf32>, i32 -> vector<16x256xf32>
    %cst_13 = arith.constant 0.000000e+00 : f32
    %42 = vector.shape_cast %19 : vector<16x1xi1> to vector<16x1xi1>
    %43 = vector.broadcast %42 : vector<16x1xi1> to vector<16x256xi1>
    %44 = vector.broadcast %cst_13 : f32 to vector<16x256xf32>
    %45 = arith.select %43, %41, %44 : vector<16x256xi1>, vector<16x256xf32>
    %c15_i32_14 = arith.constant 15 : i32
    %46 = tpu.dynamic_rotate %40 by %c15_i32_14 dim 0 : vector<16x256xf32>, i32 -> vector<16x256xf32>
    %cst_15 = arith.constant 0.000000e+00 : f32
    %47 = vector.shape_cast %21 : vector<16x1xi1> to vector<16x1xi1>
    %48 = vector.broadcast %47 : vector<16x1xi1> to vector<16x256xi1>
    %49 = vector.broadcast %cst_15 : f32 to vector<16x256xf32>
    %50 = arith.select %48, %46, %49 : vector<16x256xi1>, vector<16x256xf32>
    %51 = tpu.concatenate %45, %40, %50 in 1 : vector<16x256xf32>, vector<16x256xf32>, vector<16x256xf32> -> vector<16x768xf32>
    %52 = arith.truncf %51 : vector<16x768xf32> to vector<16x768xbf16>
    %c0_16 = arith.constant 0 : index
    %c0_17 = arith.constant 0 : index
    %53 = vector.load %arg3[%c0_16, %c0_17] : memref<768x256xbf16, #tpu.memory_space<vmem>>, vector<768x256xbf16>
    %cst_18 = arith.constant dense<0.000000e+00> : vector<16x256xf32>
    %54 = tpu.matmul %52, %53, %cst_18 {dimension_numbers = #tpu.dot_dimension_numbers<[1], [0], [0], [1], [0, 0, 1, 1], [], []>} : vector<16x768xbf16>, vector<768x256xbf16>, vector<16x256xf32> -> vector<16x256xf32>
    %55 = arith.addf %54, %0 : vector<16x256xf32>
    %cst_19 = arith.constant 0.000000e+00 : f32
    %56 = vector.broadcast %cst_19 : f32 to vector<16x256xf32>
    %57 = arith.cmpf oge, %55, %56 : vector<16x256xf32>
    %cst_20 = arith.constant 0.00999999977 : f32
    %58 = vector.broadcast %cst_20 : f32 to vector<16x256xf32>
    %59 = arith.mulf %58, %55 : vector<16x256xf32>
    %60 = arith.select %57, %55, %59 : vector<16x256xi1>, vector<16x256xf32>
    %c0_21 = arith.constant 0 : index
    %c0_22 = arith.constant 0 : index
    %61 = vector.load %arg4[%c0_21, %c0_22] : memref<16x256xf32, #tpu.memory_space<vmem>>, vector<16x256xf32>
    tpu.vector_store %arg4[%c0_21, %c0_22], %60 {strides = array<i32>} : memref<16x256xf32, #tpu.memory_space<vmem>>, vector<16x256xf32>,
    return
  }
  func.func @transform_0(%arg0: i32) -> (i32, i32) {
    %c0_i32 = arith.constant 0 : i32
    %c0_i32_0 = arith.constant 0 : i32
    %c0_i32_1 = arith.constant 0 : i32
    return %c0_i32, %c0_i32_0 : i32, i32
  }
  func.func @transform_1(%arg0: i32) -> (i32, i32) {
    %c0_i32 = arith.constant 0 : i32
    %c0_i32_0 = arith.constant 0 : i32
    %c0_i32_1 = arith.constant 0 : i32
    return %c0_i32, %c0_i32_0 : i32, i32
  }
  func.func @transform_2(%arg0: i32) -> (i32, i32) {
    %c0_i32 = arith.constant 0 : i32
    %c0_i32_0 = arith.constant 0 : i32
    %c0_i32_1 = arith.constant 0 : i32
    return %c0_i32, %c0_i32_0 : i32, i32
  }
  func.func @transform_3(%arg0: i32) -> (i32, i32) {
    %c0_i32 = arith.constant 0 : i32
    %c0_i32_0 = arith.constant 0 : i32
    %c0_i32_1 = arith.constant 0 : i32
    return %c0_i32, %c0_i32_0 : i32, i32
  }
}

</mosaic_0001>

<bundles_post_ra>
// kernel: tpu_custom_call.1
= control target key start
LH: loop header
LB: loop body
LE: loop exit
PB: predicated region body
PF: predicated region fallthrough
CT: control target
= control target key end

     0   :  { %8 = vsyncpa [#allocation3], 0  ;;  %s3040_s0 = inlined_call_operand.hbm [shape: f32[16,256], index: 0, kind: input, shape index: {}]   ;;  %s3041_s1 = inlined_call_operand.hbm [shape: bf16[768,256], index: 1, kind: input, shape index: {}]   ;;  %s3042_s2 = inlined_call_operand.hbm [shape: bf16[768,256], index: 2, kind: input, shape index: {}]   ;;  %s3043_s3 = inlined_call_operand.hbm [shape: f32[16,256], index: 3, kind: output, shape index: {}]  }
   0x1   :  { %9 = vsyncpa [#allocation6], 0  ;;  %s28_s14 = sshll.u32 %s3041_s1, 4  ;;  %s29_s14 = int_to_ptr.hbm [resolvable:$true] %s28_s14 }
   0x2   :  { %10 = vsyncpa [#allocation4], 0  ;;  %s2825_s15 = smov [#allocation5]   ;;  %s15_s19 = sshll.u32 %s3040_s0, 4  ;;  %s16_s19 = int_to_ptr.hbm [resolvable:$true] %s15_s19 }
   0x3   :  { %s30_s16 = sshll.u32 %s2825_s15, 4  ;;  %s2826_s20 = smov 128   ;;  %s31_s16 = int_to_ptr.vmem [resolvable:$true] %s30_s16 }
   0x4   :  { %s2827_s21 = smov 8   ;;  %s2828_s22 = smov [#allocation2]  }
   0x5   :  { %36 = dma.hbm_to_vmem [thread:$0]  %s29_s14, 12288, %s31_s16, [#allocation6], %s2826_s20, %s2826_s20, %s2827_s21  }
   0x6   :  { %s17_s23 = sshll.u32 %s2828_s22, 4  ;;  %s2829_s24 = smov 256   ;;  %s18_s23 = int_to_ptr.vmem [resolvable:$true] %s17_s23 }
   0x7   :  { %s2830_s25 = smov 16   ;;  %s41_s27 = sshll.u32 %s3042_s2, 4  ;;  %s42_s27 = int_to_ptr.hbm [resolvable:$true] %s41_s27 }
   0x8   :  { %23 = dma.hbm_to_vmem [thread:$0]  %s16_s19, 512, %s18_s23, [#allocation3], %s2829_s24, %s2829_s24, %s2830_s25  }
   0x9   :  { %s2831_s28 = smov [#allocation7]  }
   0xa   :  { %s43_s0 = sshll.u32 %s2831_s28, 4  ;;  %s44_s0 = int_to_ptr.vmem [resolvable:$true] %s43_s0 }
   0xb   :  { %49 = dma.hbm_to_vmem [thread:$0]  %s42_s27, 12288, %s44_s0, [#allocation6], %s2826_s20, %s2826_s20, %s2827_s21  }
   0xc   :  { %2819 = dma.done.wait [#allocation3], 512  }
   0xd   :  { %2820 = vsyncadd [#allocation3], 4294966784 }
   0xe   :  { %2821 = dma.done.wait [#allocation6], 24576  }
   0xf   :  { %2822 = vsyncadd [#allocation6], 4294942720  ;;  %v1761_v0 = vld [vmem:[#allocation5 + $0x70] sm:$0xf]  ;;  %v2534_v1 = vld [vmem:[#allocation5 + $0x74] sm:$0xf0] }
  0x10   :  { %v1825_v2 = vld [vmem:[#allocation5 + $0xf0] sm:$0xf]  ;;  %v1762_v3 = vor.u32 %v2534_v1, %v1761_v0  ;;  %v2550_v4 = vld [vmem:[#allocation5 + $0xf4] sm:$0xf0]  ;;  %v1753_v11 = vld [vmem:[#allocation5 + $0x60] sm:$0xf] }
  0x11   :  { %v1889_v5 = vld [vmem:[#allocation5 + $0x170] sm:$0xf]  ;;  %v2566_v6 = vld [vmem:[#allocation5 + $0x174] sm:$0xf0]  ;;  %v1826_v7 = vor.u32 %v2550_v4, %v1825_v2  ;;  %v2532_v13 = vld [vmem:[#allocation5 + $0x64] sm:$0xf0] }
  0x12   :  { %v1890_v8 = vor.u32 %v2566_v6, %v1889_v5  ;;  %v1953_v9 = vld [vmem:[#allocation5 + $0x1f0] sm:$0xf]  ;;  %v2582_v10 = vld [vmem:[#allocation5 + $0x1f4] sm:$0xf0]  ;;  %713 = vmatpush.bf16.msra.mxu0 %v1762_v3  ;;  %v1817_v14 = vld [vmem:[#allocation5 + $0xe0] sm:$0xf]  ;;  %v1754_v16 = vor.u32 %v2532_v13, %v1753_v11 }
  0x13   :  { %v1954_v12 = vor.u32 %v2582_v10, %v1953_v9  ;;  %v2548_v15 = vld [vmem:[#allocation5 + $0xe4] sm:$0xf0]  ;;  %727 = vmatpush.bf16.msra.mxu1 %v1826_v7  ;;  %v1881_v18 = vld [vmem:[#allocation5 + $0x160] sm:$0xf]  ;;  %v1745_v23 = vld [vmem:[#allocation5 + $0x50] sm:$0xf] }
  0x14   :  { %741 = vmatpush.bf16.msra.mxu2 %v1890_v8  ;;  %v1818_v17 = vor.u32 %v2548_v15, %v1817_v14  ;;  %v2564_v19 = vld [vmem:[#allocation5 + $0x164] sm:$0xf0]  ;;  %v1945_v20 = vld [vmem:[#allocation5 + $0x1e0] sm:$0xf]  ;;  %v2530_v24 = vld [vmem:[#allocation5 + $0x54] sm:$0xf0] }
  0x15   :  { %755 = vmatpush.bf16.msra.mxu3 %v1954_v12  ;;  %v1882_v21 = vor.u32 %v2564_v19, %v1881_v18  ;;  %v2580_v22 = vld [vmem:[#allocation5 + $0x1e4] sm:$0xf0]  ;;  %v1809_v26 = vld [vmem:[#allocation5 + $0xd0] sm:$0xf]  ;;  %v2546_v27 = vld [vmem:[#allocation5 + $0xd4] sm:$0xf0]  ;;  %v1746_v29 = vor.u32 %v2530_v24, %v1745_v23 }
  0x16   :  { %v1946_v25 = vor.u32 %v2580_v22, %v1945_v20  ;;  %v1873_v28 = vld [vmem:[#allocation5 + $0x150] sm:$0xf]  ;;  %714 = vmatpush.bf16.msra.mxu0 %v1754_v16  ;;  %v2562_v30 = vld [vmem:[#allocation5 + $0x154] sm:$0xf0]  ;;  %v1810_v33 = vor.u32 %v2546_v27, %v1809_v26  ;;  %v1737_v35 = vld [vmem:[#allocation5 + $0x40] sm:$0xf] }
  0x17   :  { %v1937_v31 = vld [vmem:[#allocation5 + $0x1d0] sm:$0xf]  ;;  %v2578_v32 = vld [vmem:[#allocation5 + $0x1d4] sm:$0xf0]  ;;  %728 = vmatpush.bf16.msra.mxu1 %v1818_v17  ;;  %v1874_v34 = vor.u32 %v2562_v30, %v1873_v28  ;;  %v2528_v36 = vld [vmem:[#allocation5 + $0x44] sm:$0xf0] }
  0x18   :  { %742 = vmatpush.bf16.msra.mxu2 %v1882_v21  ;;  %v1801_v37 = vld [vmem:[#allocation5 + $0xc0] sm:$0xf]  ;;  %v1938_v38 = vor.u32 %v2578_v32, %v1937_v31  ;;  %v2544_v39 = vld [vmem:[#allocation5 + $0xc4] sm:$0xf0]  ;;  %v1738_v44 = vor.u32 %v2528_v36, %v1737_v35  ;;  %v1729_v47 = vld [vmem:[#allocation5 + $0x30] sm:$0xf] }
  0x19   :  { %756 = vmatpush.bf16.msra.mxu3 %v1946_v25  ;;  %v1865_v40 = vld [vmem:[#allocation5 + $0x140] sm:$0xf]  ;;  %v2560_v41 = vld [vmem:[#allocation5 + $0x144] sm:$0xf0]  ;;  %v1802_v45 = vor.u32 %v2544_v39, %v1801_v37  ;;  %v2526_v48 = vld [vmem:[#allocation5 + $0x34] sm:$0xf0]  ;;  %v66_v39 = vlaneseq }
  0x1a   :  { %v1929_v42 = vld [vmem:[#allocation5 + $0x1c0] sm:$0xf]  ;;  %v2576_v43 = vld [vmem:[#allocation5 + $0x1c4] sm:$0xf0]  ;;  %715 = vmatpush.bf16.msra.mxu0 %v1746_v29  ;;  %v1866_v46 = vor.u32 %v2560_v41, %v1865_v40  ;;  %v1793_v49 = vld [vmem:[#allocation5 + $0xb0] sm:$0xf]  ;;  %v1730_v56 = vor.u32 %v2526_v48, %v1729_v47 }
  0x1b   :  { %729 = vmatpush.bf16.msra.mxu1 %v1810_v33  ;;  %v1930_v50 = vor.u32 %v2576_v43, %v1929_v42  ;;  %v2542_v51 = vld [vmem:[#allocation5 + $0xb4] sm:$0xf0]  ;;  %v1857_v52 = vld [vmem:[#allocation5 + $0x130] sm:$0xf]  ;;  %v1721_v59 = vld [vmem:[#allocation5 + $0x20] sm:$0xf] }
  0x1c   :  { %743 = vmatpush.bf16.msra.mxu2 %v1874_v34  ;;  %v2558_v53 = vld [vmem:[#allocation5 + $0x134] sm:$0xf0]  ;;  %v1921_v54 = vld [vmem:[#allocation5 + $0x1b0] sm:$0xf]  ;;  %v1794_v57 = vor.u32 %v2542_v51, %v1793_v49  ;;  %v2524_v60 = vld [vmem:[#allocation5 + $0x24] sm:$0xf0] }
  0x1d   :  { %757 = vmatpush.bf16.msra.mxu3 %v1938_v38  ;;  %v2574_v55 = vld [vmem:[#allocation5 + $0x1b4] sm:$0xf0]  ;;  %v1858_v58 = vor.u32 %v2558_v53, %v1857_v52  ;;  %v1785_v61 = vld [vmem:[#allocation5 + $0xa0] sm:$0xf]  ;;  %v2540_v63 = vld [vmem:[#allocation5 + $0xa4] sm:$0xf0]  ;;  %v1722_v4 = vor.u32 %v2524_v60, %v1721_v59 }
  0x1e   :  { %716 = vmatpush.bf16.msra.mxu0 %v1738_v44  ;;  %v1922_v62 = vor.u32 %v2574_v55, %v1921_v54  ;;  %v1849_v0 = vld [vmem:[#allocation5 + $0x120] sm:$0xf]  ;;  %v2556_v1 = vld [vmem:[#allocation5 + $0x124] sm:$0xf0]  ;;  %v1786_v5 = vor.u32 %v2540_v63, %v1785_v61  ;;  %v1713_v7 = vld [vmem:[#allocation5 + $0x10] sm:$0xf] }
  0x1f   :  { %730 = vmatpush.bf16.msra.mxu1 %v1802_v45  ;;  %v1913_v2 = vld [vmem:[#allocation5 + $0x1a0] sm:$0xf]  ;;  %v2572_v3 = vld [vmem:[#allocation5 + $0x1a4] sm:$0xf0]  ;;  %v1850_v6 = vor.u32 %v2556_v1, %v1849_v0  ;;  %v2522_v8 = vld [vmem:[#allocation5 + $0x14] sm:$0xf0] }
  0x20   :  { %744 = vmatpush.bf16.msra.mxu2 %v1866_v46  ;;  %v1777_v9 = vld [vmem:[#allocation5 + $0x90] sm:$0xf]  ;;  %v1914_v10 = vor.u32 %v2572_v3, %v1913_v2  ;;  %v2538_v11 = vld [vmem:[#allocation5 + $0x94] sm:$0xf0]  ;;  %v1714_v16 = vor.u32 %v2522_v8, %v1713_v7  ;;  %v1705_v17 = vld [vmem:[#allocation5] sm:$0xf] }
  0x21   :  { %758 = vmatpush.bf16.msra.mxu3 %v1930_v50  ;;  %v1841_v12 = vld [vmem:[#allocation5 + $0x110] sm:$0xf]  ;;  %v2554_v13 = vld [vmem:[#allocation5 + $0x114] sm:$0xf0]  ;;  %v2520_v18 = vld [vmem:[#allocation5 + $0x4] sm:$0xf0]  ;;  %v1778_v19 = vor.u32 %v2538_v11, %v1777_v9 }
  0x22   :  { %717 = vmatpush.bf16.msra.mxu0 %v1730_v56  ;;  %v1905_v14 = vld [vmem:[#allocation5 + $0x190] sm:$0xf]  ;;  %v2570_v15 = vld [vmem:[#allocation5 + $0x194] sm:$0xf0]  ;;  %v1842_v20 = vor.u32 %v2554_v13, %v1841_v12  ;;  %v1769_v21 = vld [vmem:[#allocation5 + $0x80] sm:$0xf]  ;;  %v1706_v31 = vor.u32 %v2520_v18, %v1705_v17 }
  0x23   :  { %731 = vmatpush.bf16.msra.mxu1 %v1794_v57  ;;  %v2536_v22 = vld [vmem:[#allocation5 + $0x84] sm:$0xf0]  ;;  %v1833_v23 = vld [vmem:[#allocation5 + $0x100] sm:$0xf]  ;;  %v1906_v24 = vor.u32 %v2570_v15, %v1905_v14  ;;  %v2017_v28 = vld [vmem:[#allocation5 + $0x270] sm:$0xf] }
  0x24   :  { %745 = vmatpush.bf16.msra.mxu2 %v1858_v58  ;;  %v2552_v25 = vld [vmem:[#allocation5 + $0x104] sm:$0xf0]  ;;  %v1897_v26 = vld [vmem:[#allocation5 + $0x180] sm:$0xf]  ;;  %v2598_v29 = vld [vmem:[#allocation5 + $0x274] sm:$0xf0]  ;;  %v1770_v35 = vor.u32 %v2536_v22, %v1769_v21 }
  0x25   :  { %759 = vmatpush.bf16.msra.mxu3 %v1922_v62  ;;  %v2568_v27 = vld [vmem:[#allocation5 + $0x184] sm:$0xf0]  ;;  %v2081_v30 = vld [vmem:[#allocation5 + $0x2f0] sm:$0xf]  ;;  %v2614_v32 = vld [vmem:[#allocation5 + $0x2f4] sm:$0xf0]  ;;  %v1834_v36 = vor.u32 %v2552_v25, %v1833_v23  ;;  %v2018_v41 = vor.u32 %v2598_v29, %v2017_v28 }
  0x26   :  { %718 = vmatpush.bf16.msra.mxu0 %v1722_v4  ;;  %v2533_v33 = vld [vmem:[#allocation5 + $0x74] sm:$0xf]  ;;  %v1763_v34 = vld [vmem:[#allocation5 + $0x78] sm:$0xf0]  ;;  %v1898_v40 = vor.u32 %v2568_v27, %v1897_v26  ;;  %v2009_v42 = vld [vmem:[#allocation5 + $0x260] sm:$0xf]  ;;  %v2082_v44 = vor.u32 %v2614_v32, %v2081_v30 }
  0x27   :  { %732 = vmatpush.bf16.msra.mxu1 %v1786_v5  ;;  %v2549_v37 = vld [vmem:[#allocation5 + $0xf4] sm:$0xf]  ;;  %v1827_v38 = vld [vmem:[#allocation5 + $0xf8] sm:$0xf0]  ;;  %v2596_v43 = vld [vmem:[#allocation5 + $0x264] sm:$0xf0]  ;;  %v1766_v45 = vor.u32 %v2533_v33, %v1763_v34 }
  0x28   :  { %746 = vmatpush.bf16.msra.mxu2 %v1850_v6  ;;  %v2073_v46 = vld [vmem:[#allocation5 + $0x2e0] sm:$0xf]  ;;  %v2612_v47 = vld [vmem:[#allocation5 + $0x2e4] sm:$0xf0]  ;;  %v2531_v48 = vld [vmem:[#allocation5 + $0x64] sm:$0xf]  ;;  %v1830_v49 = vor.u32 %v2549_v37, %v1827_v38  ;;  %v2010_v53 = vor.u32 %v2596_v43, %v2009_v42 }
  0x29   :  { %760 = vmatpush.bf16.msra.mxu3 %v1914_v10  ;;  %v1755_v50 = vld [vmem:[#allocation5 + $0x68] sm:$0xf0]  ;;  %v2547_v51 = vld [vmem:[#allocation5 + $0xe4] sm:$0xf]  ;;  %v2001_v54 = vld [vmem:[#allocation5 + $0x250] sm:$0xf]  ;;  %v2074_v58 = vor.u32 %v2612_v47, %v2073_v46 }
  0x2a   :  { %719 = vmatpush.bf16.msra.mxu0 %v1714_v16  ;;  %v1819_v52 = vld [vmem:[#allocation5 + $0xe8] sm:$0xf0]  ;;  %v2865_v55 = vld [vmem:[#allocation2] sm:$0xff]  ;;  %v2867_v56 = vld [vmem:[#allocation2 + $0x10] sm:$0xff]  ;;  %v2869_v57 = vshrl.u32 %v66_v39, 7  ;;  %v1758_v0 = vor.u32 %v2531_v48, %v1755_v50  ;;  %s2832_s2 = smov [#allocation8]  }
  0x2b   :  { %733 = vmatpush.bf16.msra.mxu1 %v1778_v19  ;;  %v2594_v59 = vld [vmem:[#allocation5 + $0x254] sm:$0xf0]  ;;  %v2065_v60 = vld [vmem:[#allocation5 + $0x2d0] sm:$0xf]  ;;  %v97_v61 = vrot.slane %v2865_v55, 7  ;;  %v99_v62 = vrot.slane %v2867_v56, 7  ;;  %v2875_v63 = vpack.c.bf16 %v2867_v56, %v2865_v55  ;;  %v1822_v5 = vor.u32 %v2547_v51, %v1819_v52 }
  0x2c   :  { %747 = vmatpush.bf16.msra.mxu2 %v1842_v20  ;;  %v2610_v1 = vld [vmem:[#allocation5 + $0x2d4] sm:$0xf0]  ;;  %v2878_v2 = vadd.s32 8, %v2869_v57  ;;  %v73_v3 = vand.u32 7, %v2869_v57  ;;  %vm101_vm0 = vcmp.lt.s32.totalorder %v2869_v57, 1  ;;  %v2882_v4 = vld [vmem:[#allocation2 + $0x8] sm:$0xff]  ;;  %v2002_v16 = vor.u32 %v2594_v59, %v2001_v54 }
  0x2d   :  { %761 = vmatpush.bf16.msra.mxu3 %v1906_v24  ;;  %v2529_v6 = vld [vmem:[#allocation5 + $0x54] sm:$0xf]  ;;  %v1747_v7 = vld [vmem:[#allocation5 + $0x58] sm:$0xf0]  ;;  %v102_v9 = vsel %vm101_vm0, %v97_v61, %v99_v62  ;;  %v104_v10 = vsel %vm101_vm0, %v99_v62, %v97_v61  ;;  %v1993_v17 = vld [vmem:[#allocation5 + $0x240] sm:$0xf]  ;;  %v2066_v22 = vor.u32 %v2610_v1, %v2065_v60 }
  0x2e   :  { %720 = vmatpush.bf16.msra.mxu0 %v1706_v31  ;;  %v2545_v8 = vld [vmem:[#allocation5 + $0xd4] sm:$0xf]  ;;  %v1811_v11 = vld [vmem:[#allocation5 + $0xd8] sm:$0xf0]  ;;  %v80_v12 = vand.u32 7, %v2878_v2  ;;  %vm2892_vm1 = vcmp.gt.s32.totalorder %v73_v3, 0  ;;  %v2896_v14 = vpack.c.bf16 %v102_v9, %v104_v10  ;;  %v1750_v23 = vor.u32 %v2529_v6, %v1747_v7 }
  0x2f   :  { %734 = vmatpush.bf16.msra.mxu1 %v1770_v35  ;;  %v2898_v15 = vld [vmem:[#allocation2 + $0x18] sm:$0xff]  ;;  %v2592_v18 = vld [vmem:[#allocation5 + $0x244] sm:$0xf0]  ;;  %v98_v19 = vrot.slane %v2882_v4, 7  ;;  %v2057_v24 = vld [vmem:[#allocation5 + $0x2c0] sm:$0xf]  ;;  %v1814_v26 = vor.u32 %v2545_v8, %v1811_v11 }
  0x30   :  { %748 = vmatpush.bf16.msra.mxu2 %v1834_v36  ;;  %v100_v20 = vrot.slane %v2898_v15, 7  ;;  %v2904_v21 = vpack.c.bf16 %v2898_v15, %v2882_v4  ;;  %v2608_v25 = vld [vmem:[#allocation5 + $0x2c4] sm:$0xf0]  ;;  %vm94_vm2 = vcmp.gt.s32.totalorder %v80_v12, 0  ;;  %v2527_v27 = vld [vmem:[#allocation5 + $0x44] sm:$0xf]  ;;  %v1994_v35 = vor.u32 %v2592_v18, %v1993_v17 }
  0x31   :  { %762 = vmatpush.bf16.msra.mxu3 %v1898_v40  ;;  %v1739_v28 = vld [vmem:[#allocation5 + $0x48] sm:$0xf0]  ;;  %vm2910_vm3 = vmpackc.low %vm94_vm2, %vm2892_vm1  ;;  %v2543_v32 = vld [vmem:[#allocation5 + $0xc4] sm:$0xf]  ;;  %v2058_v36 = vor.u32 %v2608_v25, %v2057_v24  ;;  %vm2929_vm4 = vcmp.lt.s32.totalorder %v73_v3, 7  ;;  %v116_v3 = vrot.slane %v2867_v56, 1 }
  0x32   :  { %769 = vmatpush.bf16.msrb.mxu0 %v2018_v41  ;;  %v103_v30 = vsel %vm101_vm0, %v98_v19, %v100_v20  ;;  %v105_v31 = vsel %vm101_vm0, %v100_v20, %v98_v19  ;;  %v1803_v33 = vld [vmem:[#allocation5 + $0xc8] sm:$0xf0]  ;;  %v1742_v37 = vor.u32 %v2527_v27, %v1739_v28  ;;  %v1985_v38 = vld [vmem:[#allocation5 + $0x230] sm:$0xf]  ;;  %v2590_v39 = vld [vmem:[#allocation5 + $0x234] sm:$0xf0] }
  0x33   :  { %783 = vmatpush.bf16.msrb.mxu1 %v2082_v44  ;;  %749 = vmatmul.bf16.vlgmr.msra.gmra.mxu2 %v2875_v63  ;;  %v2921_v34 = vpack.c.bf16 %v103_v30, %v105_v31  ;;  %v2049_v40 = vld [vmem:[#allocation5 + $0x2b0] sm:$0xf]  ;;  %v1806_v41 = vor.u32 %v2543_v32, %v1803_v33  ;;  %v2606_v42 = vld [vmem:[#allocation5 + $0x2b4] sm:$0xf0]  ;;  %v2525_v43 = vld [vmem:[#allocation5 + $0x34] sm:$0xf]  ;;  %v1986_v47 = vor.u32 %v2590_v39, %v1985_v38 }
  0x34   :  { %797 = vmatpush.bf16.msrb.mxu2 %v1766_v45  ;;  %2089 = vmatmul.msk.bf16.vlgmr.msra.gmra.mxu0 %vm2910_vm3, %v2896_v14  ;;  %v1731_v44 = vld [vmem:[#allocation5 + $0x38] sm:$0xf0]  ;;  %v2541_v45 = vld [vmem:[#allocation5 + $0xb4] sm:$0xf]  ;;  %v2050_v48 = vor.u32 %v2606_v42, %v2049_v40  ;;  %v1977_v50 = vld [vmem:[#allocation5 + $0x220] sm:$0xf] }
  0x35   :  { %811 = vmatpush.bf16.msrb.mxu3 %v1830_v49  ;;  %2092 = vmatmul.msk.bf16.vlgmr.msra.gmra.mxu1 %vm2910_vm3, %v2921_v34  ;;  %v1795_v46 = vld [vmem:[#allocation5 + $0xb8] sm:$0xf0]  ;;  %v1734_v49 = vor.u32 %v2525_v43, %v1731_v44  ;;  %v2588_v51 = vld [vmem:[#allocation5 + $0x224] sm:$0xf0]  ;;  %v2041_v52 = vld [vmem:[#allocation5 + $0x2a0] sm:$0xf] }
  0x36   :  { %770 = vmatpush.bf16.msrb.mxu0 %v2010_v53  ;;  %763 = vmatmul.bf16.vlgmr.msra.gmra.mxu3 %v2904_v21  ;;  %v1798_v53 = vor.u32 %v2541_v45, %v1795_v46  ;;  %v2604_v54 = vld [vmem:[#allocation5 + $0x2a4] sm:$0xf0]  ;;  %v1723_v59 = vld [vmem:[#allocation5 + $0x28] sm:$0xf0]  ;;  %v2539_v60 = vld [vmem:[#allocation5 + $0xa4] sm:$0xf]  ;;  %v1978_v62 = vor.u32 %v2588_v51, %v1977_v50 }
  0x37   :  { %784 = vmatpush.bf16.msrb.mxu1 %v2074_v58  ;;  %v2523_v58 = vld [vmem:[#allocation5 + $0x24] sm:$0xf]  ;;  %v1787_v61 = vld [vmem:[#allocation5 + $0xa8] sm:$0xf0]  ;;  %v2042_v1 = vor.u32 %v2604_v54, %v2041_v52  ;;  %v2586_v6 = vld [vmem:[#allocation5 + $0x214] sm:$0xf0] }
  0x38   :  { %798 = vmatpush.bf16.msrb.mxu2 %v1758_v0  ;;  %v1969_v0 = vld [vmem:[#allocation5 + $0x210] sm:$0xf]  ;;  %v2602_v8 = vld [vmem:[#allocation5 + $0x294] sm:$0xf0]  ;;  %v1790_v9 = vor.u32 %v2539_v60, %v1787_v61  ;;  %v2521_v10 = vld [vmem:[#allocation5 + $0x14] sm:$0xf] }
  0x39   :  { %812 = vmatpush.bf16.msrb.mxu3 %v1822_v5  ;;  %v1726_v5 = vor.u32 %v2523_v58, %v1723_v59  ;;  %v2033_v7 = vld [vmem:[#allocation5 + $0x290] sm:$0xf]  ;;  %v1715_v11 = vld [vmem:[#allocation5 + $0x18] sm:$0xf0]  ;;  %v2537_v13 = vld [vmem:[#allocation5 + $0x94] sm:$0xf]  ;;  %v1970_v20 = vor.u32 %v2586_v6, %v1969_v0 }
  0x3a   :  { %771 = vmatpush.bf16.msrb.mxu0 %v2002_v16  ;;  %v1779_v17 = vld [vmem:[#allocation5 + $0x98] sm:$0xf0]  ;;  %v1961_v18 = vld [vmem:[#allocation5 + $0x200] sm:$0xf]  ;;  %v2584_v19 = vld [vmem:[#allocation5 + $0x204] sm:$0xf0]  ;;  %v2034_v25 = vor.u32 %v2602_v8, %v2033_v7 }
  0x3b   :  { %785 = vmatpush.bf16.msrb.mxu1 %v2066_v22  ;;  %v2025_v22 = vld [vmem:[#allocation5 + $0x280] sm:$0xf]  ;;  %v2519_v24 = vld [vmem:[#allocation5 + $0x4] sm:$0xf]  ;;  %v1707_v27 = vld [vmem:[#allocation5 + $0x8] sm:$0xf0]  ;;  %v1782_v31 = vor.u32 %v2537_v13, %v1779_v17  ;;  %v1962_v39 = vor.u32 %v2584_v19, %v1961_v18 }
  0x3c   :  { %799 = vmatpush.bf16.msrb.mxu2 %v1750_v23  ;;  %v2600_v23 = vld [vmem:[#allocation5 + $0x284] sm:$0xf0]  ;;  %v2535_v28 = vld [vmem:[#allocation5 + $0x84] sm:$0xf]  ;;  %v114_v30 = vrot.slane %v2865_v55, 1  ;;  %vm118_vm5 = vcmp.lt.s32.totalorder %v2869_v57, 7  ;;  %v1710_v56 = vor.u32 %v2519_v24, %v1707_v27 }
  0x3d   :  { %813 = vmatpush.bf16.msrb.mxu3 %v1814_v26  ;;  %v1718_v26 = vor.u32 %v2521_v10, %v1715_v11  ;;  %v1771_v32 = vld [vmem:[#allocation5 + $0x88] sm:$0xf0]  ;;  %v115_v33 = vrot.slane %v2882_v4, 1  ;;  %v2581_v38 = vld [vmem:[#allocation5 + $0x1f4] sm:$0xf]  ;;  %v2026_v40 = vor.u32 %v2600_v23, %v2025_v22  ;;  %vm2940_vm6 = vcmp.lt.s32.totalorder %v80_v12, 7 }
  0x3e   :  { %772 = vmatpush.bf16.msrb.mxu0 %v1994_v35  ;;  %v117_v35 = vrot.slane %v2898_v15, 1  ;;  %v2597_v42 = vld [vmem:[#allocation5 + $0x274] sm:$0xf]  ;;  %v2019_v55 = vld [vmem:[#allocation5 + $0x278] sm:$0xf0]  ;;  %v119_v15 = vsel %vm118_vm5, %v114_v30, %v116_v3  ;;  %v121_v45 = vsel %vm118_vm5, %v116_v3, %v114_v30  ;;  %v1774_v46 = vor.u32 %v2535_v28, %v1771_v32  ;;  %vm2958_vm7 = vmpackc.low %vm2940_vm6, %vm2929_vm4  ;;  %s1687_s29 = sshll.u32 %s2832_s2, 4  ;;  %s1688_s29 = int_to_ptr.vmem [resolvable:$true] %s1687_s29 }
  0x3f   :  { %786 = vmatpush.bf16.msrb.mxu1 %v2058_v36  ;;  %v2565_v36 = vld [vmem:[#allocation5 + $0x174] sm:$0xf]  ;;  %v2083_v44 = vld [vmem:[#allocation5 + $0x2f8] sm:$0xf0]  ;;  %v2022_v12 = vor.u32 %v2597_v42, %v2019_v55  ;;  %v2563_v50 = vld [vmem:[#allocation5 + $0x164] sm:$0xf]  ;;  %v2952_v54 = vpack.c.bf16 %v121_v45, %v119_v15 }
  0x40   :  { %800 = vmatpush.bf16.msrb.mxu2 %v1742_v37  ;;  %v1891_v37 = vld [vmem:[#allocation5 + $0x178] sm:$0xf0]  ;;  %v2613_v43 = vld [vmem:[#allocation5 + $0x2f4] sm:$0xf]  ;;  %v1883_v51 = vld [vmem:[#allocation5 + $0x168] sm:$0xf0] }
  0x41   :  { %814 = vmatpush.bf16.msrb.mxu3 %v1806_v41  ;;  %v1955_v41 = vld [vmem:[#allocation5 + $0x1f8] sm:$0xf0]  ;;  %v2579_v52 = vld [vmem:[#allocation5 + $0x1e4] sm:$0xf]  ;;  %v1947_v58 = vld [vmem:[#allocation5 + $0x1e8] sm:$0xf0] }
  0x42   :  { %773 = vmatpush.bf16.msrb.mxu0 %v1986_v47  ;;  %v1894_v47 = vor.u32 %v2565_v36, %v1891_v37  ;;  %v1958_v2 = vor.u32 %v2581_v38, %v1955_v41  ;;  %v2595_v59 = vld [vmem:[#allocation5 + $0x264] sm:$0xf]  ;;  %v2011_v60 = vld [vmem:[#allocation5 + $0x268] sm:$0xf0]  ;;  %v1950_v6 = vor.u32 %v2579_v52, %v1947_v58  ;;  %v2561_v8 = vld [vmem:[#allocation5 + $0x154] sm:$0xf] }
  0x43   :  { %787 = vmatpush.bf16.msrb.mxu1 %v2050_v48  ;;  %v120_v48 = vsel %vm118_vm5, %v115_v33, %v117_v35  ;;  %v2611_v0 = vld [vmem:[#allocation5 + $0x2e4] sm:$0xf]  ;;  %v2014_v7 = vor.u32 %v2595_v59, %v2011_v60  ;;  %v2577_v10 = vld [vmem:[#allocation5 + $0x1d4] sm:$0xf]  ;;  %v1939_v13 = vld [vmem:[#allocation5 + $0x1d8] sm:$0xf0] }
  0x44   :  { %801 = vmatpush.bf16.msrb.mxu2 %v1734_v49  ;;  %v122_v49 = vsel %vm118_vm5, %v117_v35, %v115_v33  ;;  %v2593_v16 = vld [vmem:[#allocation5 + $0x254] sm:$0xf]  ;;  %v2003_v17 = vld [vmem:[#allocation5 + $0x258] sm:$0xf0]  ;;  %v1942_v22 = vor.u32 %v2577_v10, %v1939_v13  ;;  %v2559_v24 = vld [vmem:[#allocation5 + $0x144] sm:$0xf] }
  0x45   :  { %815 = vmatpush.bf16.msrb.mxu3 %v1798_v53  ;;  %v2086_v53 = vor.u32 %v2613_v43, %v2083_v44  ;;  %v2609_v18 = vld [vmem:[#allocation5 + $0x2d4] sm:$0xf]  ;;  %v2067_v19 = vld [vmem:[#allocation5 + $0x2d8] sm:$0xf0]  ;;  %v2006_v23 = vor.u32 %v2593_v16, %v2003_v17  ;;  %v1931_v28 = vld [vmem:[#allocation5 + $0x1c8] sm:$0xf0] }
  0x46   :  { %774 = vmatpush.bf16.msrb.mxu0 %v1978_v62  ;;  %v2962_v62 = vpack.c.bf16 %v122_v49, %v120_v48  ;;  %v2070_v27 = vor.u32 %v2609_v18, %v2067_v19  ;;  %v2591_v30 = vld [vmem:[#allocation5 + $0x244] sm:$0xf]  ;;  %v2557_v35 = vld [vmem:[#allocation5 + $0x134] sm:$0xf]  ;;  %v1859_v36 = vld [vmem:[#allocation5 + $0x138] sm:$0xf0] }
  0x47   :  { %788 = vmatpush.bf16.msrb.mxu1 %v2042_v1  ;;  %v2075_v1 = vld [vmem:[#allocation5 + $0x2e8] sm:$0xf0]  ;;  %v2607_v3 = vld [vmem:[#allocation5 + $0x2c4] sm:$0xf]  ;;  %v2573_v37 = vld [vmem:[#allocation5 + $0x1b4] sm:$0xf] }
  0x48   :  { %802 = vmatpush.bf16.msrb.mxu2 %v1726_v5  ;;  %v1886_v5 = vor.u32 %v2563_v50, %v1883_v51  ;;  %v2078_v11 = vor.u32 %v2611_v0, %v2075_v1  ;;  %v1987_v41 = vld [vmem:[#allocation5 + $0x238] sm:$0xf0]  ;;  %v2605_v42 = vld [vmem:[#allocation5 + $0x2b4] sm:$0xf]  ;;  %v2555_v4 = vld [vmem:[#allocation5 + $0x124] sm:$0xf] }
  0x49   :  { %816 = vmatpush.bf16.msrb.mxu3 %v1790_v9  ;;  %v1875_v9 = vld [vmem:[#allocation5 + $0x158] sm:$0xf0]  ;;  %v1851_v15 = vld [vmem:[#allocation5 + $0x128] sm:$0xf0]  ;;  %v2571_v45 = vld [vmem:[#allocation5 + $0x1a4] sm:$0xf] }
  0x4a   :  { %775 = vmatpush.bf16.msrb.mxu0 %v1970_v20  ;;  %v1878_v20 = vor.u32 %v2561_v8, %v1875_v9  ;;  %v2051_v55 = vld [vmem:[#allocation5 + $0x2b8] sm:$0xf0]  ;;  %v2587_v48 = vld [vmem:[#allocation5 + $0x224] sm:$0xf]  ;;  %v1979_v49 = vld [vmem:[#allocation5 + $0x228] sm:$0xf0]  ;;  %v1854_v50 = vor.u32 %v2555_v4, %v1851_v15 }
  0x4b   :  { %789 = vmatpush.bf16.msrb.mxu1 %v2034_v25  ;;  %v1867_v25 = vld [vmem:[#allocation5 + $0x148] sm:$0xf0]  ;;  %v1982_v52 = vor.u32 %v2587_v48, %v1979_v49  ;;  %v1843_v58 = vld [vmem:[#allocation5 + $0x118] sm:$0xf0]  ;;  %v2569_v59 = vld [vmem:[#allocation5 + $0x194] sm:$0xf] }
  0x4c   :  { %803 = vmatpush.bf16.msrb.mxu2 %v1718_v26  ;;  %v2575_v26 = vld [vmem:[#allocation5 + $0x1c4] sm:$0xf]  ;;  %v1870_v32 = vor.u32 %v2559_v24, %v1867_v25  ;;  %v1907_v0 = vld [vmem:[#allocation5 + $0x198] sm:$0xf0]  ;;  %v2585_v1 = vld [vmem:[#allocation5 + $0x214] sm:$0xf] }
  0x4d   :  { %817 = vmatpush.bf16.msrb.mxu3 %v1782_v31  ;;  %v2059_v31 = vld [vmem:[#allocation5 + $0x2c8] sm:$0xf0]  ;;  %v2551_v9 = vld [vmem:[#allocation5 + $0x104] sm:$0xf]  ;;  %v1910_v10 = vor.u32 %v2569_v59, %v1907_v0  ;;  %v2297_v24 = vld [vmem:[#allocation7 + $0x170] sm:$0xf] }
  0x4e   :  { %776 = vmatpush.bf16.msrb.mxu0 %v1962_v39  ;;  %v2062_v38 = vor.u32 %v2607_v3, %v2059_v31  ;;  %v1923_v39 = vld [vmem:[#allocation5 + $0x1b8] sm:$0xf0]  ;;  %v1835_v13 = vld [vmem:[#allocation5 + $0x108] sm:$0xf0]  ;;  %v2567_v16 = vld [vmem:[#allocation5 + $0x184] sm:$0xf] }
  0x4f   :  { %790 = vmatpush.bf16.msrb.mxu1 %v2026_v40  ;;  %v2589_v40 = vld [vmem:[#allocation5 + $0x234] sm:$0xf]  ;;  %v1926_v43 = vor.u32 %v2573_v37, %v1923_v39  ;;  %v1899_v17 = vld [vmem:[#allocation5 + $0x188] sm:$0xf0]  ;;  %v2583_v19 = vld [vmem:[#allocation5 + $0x204] sm:$0xf] }
  0x50   :  { %804 = vmatpush.bf16.msrb.mxu2 %v1710_v56  ;;  %v1862_v56 = vor.u32 %v2557_v35, %v1859_v36  ;;  %v1990_v44 = vor.u32 %v2589_v40, %v1987_v41  ;;  %v2662_v25 = vld [vmem:[#allocation7 + $0x174] sm:$0xf0]  ;;  %v2169_v3 = vld [vmem:[#allocation7 + $0x70] sm:$0xf]  ;;  %v2161_v36 = vld [vmem:[#allocation7 + $0x60] sm:$0xf] }
  0x51   :  { %818 = vmatpush.bf16.msrb.mxu3 %v1774_v46  ;;  %2095 = vmatmul.msk.bf16.vlgmr.msrb.gmra.mxu0 %vm2958_vm7, %v2952_v54  ;;  %v2054_v46 = vor.u32 %v2605_v42, %v2051_v55  ;;  %v2630_v31 = vld [vmem:[#allocation7 + $0x74] sm:$0xf0]  ;;  %v2628_v37 = vld [vmem:[#allocation7 + $0x64] sm:$0xf0]  ;;  %v2153_v42 = vld [vmem:[#allocation7 + $0x50] sm:$0xf] }
  0x52   :  { %825 = vmatpush.bf16.msra.mxu0 %v1894_v47  ;;  %2098 = vmatmul.msk.bf16.vlgmr.msrb.gmra.mxu1 %vm2958_vm7, %v2962_v62  ;;  %v1915_v47 = vld [vmem:[#allocation5 + $0x1a8] sm:$0xf0]  ;;  %v2658_v39 = vld [vmem:[#allocation7 + $0x154] sm:$0xf0]  ;;  %v2162_v40 = vor.u32 %v2628_v37, %v2161_v36  ;;  %v2624_v4 = vld [vmem:[#allocation7 + $0x44] sm:$0xf0] }
  0x53   :  { %839 = vmatpush.bf16.msra.mxu1 %v1958_v2  ;;  %2101 = vmatmul.msk.bf16.vlgmr.msrb.gmra.mxu2 %vm2910_vm3, %v2896_v14  ;;  %v1995_v14 = vld [vmem:[#allocation5 + $0x248] sm:$0xf0]  ;;  %v2603_v2 = vld [vmem:[#allocation5 + $0x2a4] sm:$0xf]  ;;  %v1918_v51 = vor.u32 %v2571_v45, %v1915_v47  ;;  %v2626_v55 = vld [vmem:[#allocation7 + $0x54] sm:$0xf0] }
  0x54   :  { %853 = vmatpush.bf16.msra.mxu2 %v2022_v12  ;;  %2104 = vmatmul.msk.bf16.vlgmr.msrb.gmra.mxu3 %vm2910_vm3, %v2921_v34  ;;  %v1934_v34 = vor.u32 %v2575_v26, %v1931_v28  ;;  %v1998_v33 = vor.u32 %v2591_v30, %v1995_v14  ;;  %v2043_v12 = vld [vmem:[#allocation5 + $0x2a8] sm:$0xf0]  ;;  %v1838_v26 = vor.u32 %v2551_v9, %v1835_v13  ;;  %v2265_v15 = vld [vmem:[#allocation7 + $0x130] sm:$0xf]  ;;  %v2622_v47 = vld [vmem:[#allocation7 + $0x34] sm:$0xf0] }
  0x55   :  { %867 = vmatpush.bf16.msra.mxu3 %v2086_v53  ;;  %v2553_v53 = vld [vmem:[#allocation5 + $0x114] sm:$0xf]  ;;  %v2046_v60 = vor.u32 %v2603_v2, %v2043_v12  ;;  %v2298_v14 = vor.u32 %v2662_v25, %v2297_v24  ;;  %v2257_v48 = vld [vmem:[#allocation7 + $0x120] sm:$0xf]  ;;  %v2652_v49 = vld [vmem:[#allocation7 + $0x124] sm:$0xf0] }
  0x56   :  { %826 = vmatpush.bf16.msra.mxu0 %v1886_v5  ;;  %v1971_v5 = vld [vmem:[#allocation5 + $0x218] sm:$0xf0]  ;;  %v1846_v8 = vor.u32 %v2553_v53, %v1843_v58  ;;  %v2258_v12 = vor.u32 %v2652_v49, %v2257_v48  ;;  %v2650_v58 = vld [vmem:[#allocation7 + $0x114] sm:$0xf0]  ;;  %v2616_v13 = vld [vmem:[#allocation7 + $0x4] sm:$0xf0] }
  0x57   :  { %840 = vmatpush.bf16.msra.mxu1 %v1950_v6  ;;  %v2601_v6 = vld [vmem:[#allocation5 + $0x294] sm:$0xf]  ;;  %v2618_v0 = vld [vmem:[#allocation7 + $0x14] sm:$0xf0]  ;;  %v2676_v36 = vld [vmem:[#allocation7 + $0x1e4] sm:$0xf0] }
  0x58   :  { %854 = vmatpush.bf16.msra.mxu2 %v2014_v7  ;;  %v2035_v7 = vld [vmem:[#allocation5 + $0x298] sm:$0xf0]  ;;  %v2678_v25 = vld [vmem:[#allocation7 + $0x1f4] sm:$0xf0]  ;;  %v2217_v48 = vld [vmem:[#allocation7 + $0xd0] sm:$0xf] }
  0x59   :  { %868 = vmatpush.bf16.msra.mxu3 %v2078_v11  ;;  %v1974_v11 = vor.u32 %v2585_v1, %v1971_v5  ;;  %v2038_v18 = vor.u32 %v2601_v6, %v2035_v7  ;;  %v2241_v1 = vld [vmem:[#allocation7 + $0x100] sm:$0xf]  ;;  %v2648_v6 = vld [vmem:[#allocation7 + $0x104] sm:$0xf0]  ;;  %v2629_v7 = vld [vmem:[#allocation7 + $0x74] sm:$0xf] }
  0x5a   :  { %827 = vmatpush.bf16.msra.mxu0 %v1878_v20  ;;  %v1963_v20 = vld [vmem:[#allocation5 + $0x208] sm:$0xf0]  ;;  %v2242_v9 = vor.u32 %v2648_v6, %v2241_v1  ;;  %v2642_v49 = vld [vmem:[#allocation7 + $0xd4] sm:$0xf0]  ;;  %v2209_v1 = vld [vmem:[#allocation7 + $0xc0] sm:$0xf] }
  0x5b   :  { %841 = vmatpush.bf16.msra.mxu1 %v1942_v22  ;;  %v2599_v22 = vld [vmem:[#allocation5 + $0x284] sm:$0xf]  ;;  %v1966_v28 = vor.u32 %v2583_v19, %v1963_v20  ;;  %s1689_s5 = sshll.u32 %s3043_s3, 4  ;;  %s1690_s5 = int_to_ptr.hbm [resolvable:$true] %s1689_s5 }
  0x5c   :  { %855 = vmatpush.bf16.msra.mxu2 %v2006_v23  ;;  %v2027_v23 = vld [vmem:[#allocation5 + $0x288] sm:$0xf0]  ;;  %v2627_v20 = vld [vmem:[#allocation7 + $0x64] sm:$0xf] }
  0x5d   :  { %869 = vmatpush.bf16.msra.mxu3 %v2070_v27  ;;  %v1902_v27 = vor.u32 %v2567_v16, %v1899_v17  ;;  %v2030_v30 = vor.u32 %v2599_v22, %v2027_v23  ;;  %v2425_v16 = vld [vmem:[#allocation7 + $0x270] sm:$0xf]  ;;  %v2163_v22 = vld [vmem:[#allocation7 + $0x68] sm:$0xf0]  ;;  %v2695_v29 = vld [vmem:[#allocation7 + $0x284] sm:$0xf] }
  0x5e   :  { %828 = vmatpush.bf16.msra.mxu0 %v1870_v32  ;;  %v2289_v32 = vld [vmem:[#allocation7 + $0x160] sm:$0xf]  ;;  %v2361_v23 = vld [vmem:[#allocation7 + $0x1f0] sm:$0xf]  ;;  %v2166_v24 = vor.u32 %v2627_v20, %v2163_v22 }
  0x5f   :  { %842 = vmatpush.bf16.msra.mxu1 %v1934_v34  ;;  %v2660_v34 = vld [vmem:[#allocation7 + $0x164] sm:$0xf0]  ;;  %v2201_v22 = vld [vmem:[#allocation7 + $0xb0] sm:$0xf] }
  0x60   :  { %856 = vmatpush.bf16.msra.mxu2 %v1998_v33  ;;  %v2170_v33 = vor.u32 %v2630_v31, %v2169_v3  ;;  %v2290_v35 = vor.u32 %v2660_v34, %v2289_v32  ;;  %v2155_v3 = vld [vmem:[#allocation7 + $0x58] sm:$0xf0]  ;;  %v2233_v31 = vld [vmem:[#allocation7 + $0xf0] sm:$0xf]  ;;  %v2646_v34 = vld [vmem:[#allocation7 + $0xf4] sm:$0xf0] }
  0x61   :  { %870 = vmatpush.bf16.msra.mxu3 %v2062_v38  ;;  %v2281_v38 = vld [vmem:[#allocation7 + $0x150] sm:$0xf] }
  0x62   :  { %829 = vmatpush.bf16.msra.mxu0 %v1862_v56  ;;  %v2282_v41 = vor.u32 %v2658_v39, %v2281_v38  ;;  %v2273_v56 = vld [vmem:[#allocation7 + $0x140] sm:$0xf]  ;;  %v2409_v38 = vld [vmem:[#allocation7 + $0x250] sm:$0xf]  ;;  %v2690_v39 = vld [vmem:[#allocation7 + $0x254] sm:$0xf0] }
  0x63   :  { %843 = vmatpush.bf16.msra.mxu1 %v1926_v43  ;;  %v2154_v43 = vor.u32 %v2626_v55, %v2153_v42  ;;  %v2147_v42 = vld [vmem:[#allocation7 + $0x48] sm:$0xf0] }
  0x64   :  { %857 = vmatpush.bf16.msra.mxu2 %v1990_v44  ;;  %v2145_v44 = vld [vmem:[#allocation7 + $0x40] sm:$0xf] }
  0x65   :  { %871 = vmatpush.bf16.msra.mxu3 %v2054_v46  ;;  %v2146_v45 = vor.u32 %v2624_v4, %v2145_v44  ;;  %v2137_v46 = vld [vmem:[#allocation7 + $0x30] sm:$0xf]  ;;  %v2674_v44 = vld [vmem:[#allocation7 + $0x1d4] sm:$0xf0] }
  0x66   :  { %830 = vmatpush.bf16.msra.mxu0 %v1854_v50  ;;  %v2138_v2 = vor.u32 %v2622_v47, %v2137_v46  ;;  %v2129_v50 = vld [vmem:[#allocation7 + $0x20] sm:$0xf]  ;;  %v2139_v46 = vld [vmem:[#allocation7 + $0x38] sm:$0xf0] }
  0x67   :  { %844 = vmatpush.bf16.msra.mxu1 %v1918_v51  ;;  %v2620_v51 = vld [vmem:[#allocation7 + $0x24] sm:$0xf0] }
  0x68   :  { %858 = vmatpush.bf16.msra.mxu2 %v1982_v52  ;;  %v2249_v52 = vld [vmem:[#allocation7 + $0x110] sm:$0xf]  ;;  %v2130_v53 = vor.u32 %v2620_v51, %v2129_v50  ;;  %v2672_v50 = vld [vmem:[#allocation7 + $0x1c4] sm:$0xf0] }
  0x69   :  { %872 = vmatpush.bf16.msra.mxu3 %v2046_v60  ;;  %v2250_v59 = vor.u32 %v2650_v58, %v2249_v52  ;;  %v2121_v60 = vld [vmem:[#allocation7 + $0x10] sm:$0xf] }
  0x6a   :  { %831 = vmatpush.bf16.msra.mxu0 %v1846_v8  ;;  %v2122_v5 = vor.u32 %v2618_v0, %v2121_v60  ;;  %v2171_v8 = vld [vmem:[#allocation7 + $0x78] sm:$0xf0]  ;;  %v2393_v52 = vld [vmem:[#allocation7 + $0x230] sm:$0xf]  ;;  %v2131_v60 = vld [vmem:[#allocation7 + $0x28] sm:$0xf0] }
  0x6b   :  { %845 = vmatpush.bf16.msra.mxu1 %v1910_v10  ;;  %v2174_v10 = vor.u32 %v2629_v7, %v2171_v8  ;;  %v2329_v7 = vld [vmem:[#allocation7 + $0x1b0] sm:$0xf]  ;;  %v2670_v8 = vld [vmem:[#allocation7 + $0x1b4] sm:$0xf0] }
  0x6c   :  { %859 = vmatpush.bf16.msra.mxu2 %v1974_v11  ;;  %v2113_v11 = vld [vmem:[#allocation7] sm:$0xf] }
  0x6d   :  { %873 = vmatpush.bf16.msra.mxu3 %v2038_v18  ;;  %v2114_v17 = vor.u32 %v2616_v13, %v2113_v11  ;;  %v2694_v18 = vld [vmem:[#allocation7 + $0x274] sm:$0xf0]  ;;  %v2385_v11 = vld [vmem:[#allocation7 + $0x220] sm:$0xf]  ;;  %v2684_v13 = vld [vmem:[#allocation7 + $0x224] sm:$0xf0] }
  0x6e   :  { %832 = vmatpush.bf16.msra.mxu0 %v1838_v26  ;;  %v2426_v19 = vor.u32 %v2694_v18, %v2425_v16  ;;  %v2417_v26 = vld [vmem:[#allocation7 + $0x260] sm:$0xf]  ;;  %v2617_v18 = vld [vmem:[#allocation7 + $0x14] sm:$0xf] }
  0x6f   :  { %846 = vmatpush.bf16.msra.mxu1 %v1902_v27  ;;  %v2692_v27 = vld [vmem:[#allocation7 + $0x264] sm:$0xf0] }
  0x70   :  { %860 = vmatpush.bf16.msra.mxu2 %v1966_v28  ;;  %v2362_v28 = vor.u32 %v2678_v25, %v2361_v23  ;;  %v2638_v23 = vld [vmem:[#allocation7 + $0xb4] sm:$0xf0]  ;;  %v2321_v25 = vld [vmem:[#allocation7 + $0x1a0] sm:$0xf] }
  0x71   :  { %874 = vmatpush.bf16.msra.mxu3 %v2030_v30  ;;  %833 = vmatmul.bf16.vlgmr.msra.gmra.mxu0 %v2875_v63  ;;  %v2656_v63 = vld [vmem:[#allocation7 + $0x144] sm:$0xf0]  ;;  %v2418_v30 = vor.u32 %v2692_v27, %v2417_v26 }
  0x72   :  { %847 = vmatmul.bf16.vlgmr.msra.gmra.mxu1 %v2904_v21  ;;  %1499 = vmatpush.bf16.msrb.mxu0 %v2170_v33  ;;  %v2274_v21 = vor.u32 %v2656_v63, %v2273_v56  ;;  %v2234_v33 = vor.u32 %v2646_v34, %v2233_v31  ;;  %v2225_v56 = vld [vmem:[#allocation7 + $0xe0] sm:$0xf]  ;;  %v2644_v63 = vld [vmem:[#allocation7 + $0xe4] sm:$0xf0]  ;;  %v2115_v31 = vld [vmem:[#allocation7 + $0x8] sm:$0xf0] }
  0x73   :  { %2107 = vmatmul.msk.bf16.vlgmr.msra.gmra.mxu2 %vm2958_vm7, %v2952_v54  ;;  %v2654_v54 = vld [vmem:[#allocation7 + $0x134] sm:$0xf0]  ;;  %v2668_v26 = vld [vmem:[#allocation7 + $0x1a4] sm:$0xf0]  ;;  %v2193_v34 = vld [vmem:[#allocation7 + $0xa0] sm:$0xf] }
  0x74   :  { %1527 = vmatpush.bf16.msrb.mxu2 %v2298_v14  ;;  %2110 = vmatmul.msk.bf16.vlgmr.msra.gmra.mxu3 %vm2958_vm7, %v2962_v62  ;;  %v2266_v62 = vor.u32 %v2654_v54, %v2265_v15  ;;  %v2625_v14 = vld [vmem:[#allocation7 + $0x54] sm:$0xf]  ;;  %v2401_v15 = vld [vmem:[#allocation7 + $0x240] sm:$0xf]  ;;  %v2688_v54 = vld [vmem:[#allocation7 + $0x244] sm:$0xf0]  ;;  %v2322_v27 = vor.u32 %v2668_v26, %v2321_v25 }
  0x75   :  { %v2158_v32 = vor.u32 %v2625_v14, %v2155_v3  ;;  %1541 = vmatpush.bf16.msrb.mxu3 %v2362_v28  ;;  %1513 = vmatpush.bf16.msrb.mxu1 %v2234_v33  ;;  %v2377_v28 = vld [vmem:[#allocation7 + $0x210] sm:$0xf]  ;;  %v2615_v3 = vld [vmem:[#allocation7 + $0x4] sm:$0xf]  ;;  %v2636_v33 = vld [vmem:[#allocation7 + $0xa4] sm:$0xf0] }
  0x76   :  { %1500 = vmatpush.bf16.msrb.mxu0 %v2162_v40  ;;  %v2410_v40 = vor.u32 %v2690_v39, %v2409_v38  ;;  %v2369_v39 = vld [vmem:[#allocation7 + $0x200] sm:$0xf] }
  0x78   :  { %1528 = vmatpush.bf16.msrb.mxu2 %v2290_v35  ;;  %v2353_v35 = vld [vmem:[#allocation7 + $0x1e0] sm:$0xf] }
  0x79   :  { %v2354_v37 = vor.u32 %v2676_v36, %v2353_v35  ;;  %v2194_v35 = vor.u32 %v2636_v33, %v2193_v34  ;;  %v2313_v36 = vld [vmem:[#allocation7 + $0x190] sm:$0xf] }
  0x7a   :  { %1501 = vmatpush.bf16.msrb.mxu0 %v2154_v43  ;;  %v2226_v43 = vor.u32 %v2644_v63, %v2225_v56  ;;  %v2185_v63 = vld [vmem:[#allocation7 + $0x90] sm:$0xf] }
  0x7b   :  { %1542 = vmatpush.bf16.msrb.mxu3 %v2354_v37  ;;  %v2666_v37 = vld [vmem:[#allocation7 + $0x194] sm:$0xf0] }
  0x7c   :  { %1529 = vmatpush.bf16.msrb.mxu2 %v2282_v41  ;;  %v2623_v41 = vld [vmem:[#allocation7 + $0x44] sm:$0xf]  ;;  %1514 = vmatpush.bf16.msrb.mxu1 %v2226_v43  ;;  %v2314_v38 = vor.u32 %v2666_v37, %v2313_v36  ;;  %v2634_v43 = vld [vmem:[#allocation7 + $0x94] sm:$0xf0] }
  0x7d   :  { %v2150_v55 = vor.u32 %v2623_v41, %v2147_v42 }
  0x7e   :  { %1502 = vmatpush.bf16.msrb.mxu0 %v2146_v45  ;;  %v2402_v45 = vor.u32 %v2688_v54, %v2401_v15  ;;  %v2664_v15 = vld [vmem:[#allocation7 + $0x184] sm:$0xf0] }
  0x80   :  { %1530 = vmatpush.bf16.msrb.mxu2 %v2274_v21  ;;  %v2345_v21 = vld [vmem:[#allocation7 + $0x1d0] sm:$0xf] }
  0x81   :  { %v2346_v4 = vor.u32 %v2674_v44, %v2345_v21  ;;  %v2186_v44 = vor.u32 %v2634_v43, %v2185_v63 }
  0x82   :  { %1503 = vmatpush.bf16.msrb.mxu0 %v2138_v2  ;;  %v2218_v2 = vor.u32 %v2642_v49, %v2217_v48  ;;  %v2177_v49 = vld [vmem:[#allocation7 + $0x80] sm:$0xf] }
  0x83   :  { %1543 = vmatpush.bf16.msrb.mxu3 %v2346_v4  ;;  %v2305_v4 = vld [vmem:[#allocation7 + $0x180] sm:$0xf] }
  0x84   :  { %1531 = vmatpush.bf16.msrb.mxu2 %v2266_v62  ;;  %v2621_v62 = vld [vmem:[#allocation7 + $0x34] sm:$0xf]  ;;  %1515 = vmatpush.bf16.msrb.mxu1 %v2218_v2  ;;  %v2306_v54 = vor.u32 %v2664_v15, %v2305_v4  ;;  %v2632_v2 = vld [vmem:[#allocation7 + $0x84] sm:$0xf0]  ;;  %v2299_v4 = vld [vmem:[#allocation7 + $0x178] sm:$0xf0] }
  0x85   :  { %v2142_v47 = vor.u32 %v2621_v62, %v2139_v46  ;;  %v2235_v62 = vld [vmem:[#allocation7 + $0xf8] sm:$0xf0]  ;;  %v2691_v15 = vld [vmem:[#allocation7 + $0x264] sm:$0xf] }
  0x86   :  { %1504 = vmatpush.bf16.msrb.mxu0 %v2130_v53  ;;  %v2686_v53 = vld [vmem:[#allocation7 + $0x234] sm:$0xf0] }
  0x87   :  { %v2394_v58 = vor.u32 %v2686_v53, %v2393_v52  ;;  %v2643_v53 = vld [vmem:[#allocation7 + $0xe4] sm:$0xf] }
  0x88   :  { %1532 = vmatpush.bf16.msrb.mxu2 %v2258_v12  ;;  %v2337_v12 = vld [vmem:[#allocation7 + $0x1c0] sm:$0xf] }
  0x89   :  { %v2338_v51 = vor.u32 %v2672_v50, %v2337_v12  ;;  %v2178_v12 = vor.u32 %v2632_v2, %v2177_v49  ;;  %v2489_v50 = vld [vmem:[#allocation7 + $0x2f0] sm:$0xf] }
  0x8a   :  { %1505 = vmatpush.bf16.msrb.mxu0 %v2122_v5  ;;  %v2640_v5 = vld [vmem:[#allocation7 + $0xc4] sm:$0xf0] }
  0x8b   :  { %1544 = vmatpush.bf16.msrb.mxu3 %v2338_v51  ;;  %v2210_v6 = vor.u32 %v2640_v5, %v2209_v1  ;;  %v2710_v51 = vld [vmem:[#allocation7 + $0x2f4] sm:$0xf0]  ;;  %v2481_v1 = vld [vmem:[#allocation7 + $0x2e0] sm:$0xf]  ;;  %v2708_v5 = vld [vmem:[#allocation7 + $0x2e4] sm:$0xf0] }
  0x8c   :  { %1533 = vmatpush.bf16.msrb.mxu2 %v2250_v59  ;;  %v2619_v59 = vld [vmem:[#allocation7 + $0x24] sm:$0xf]  ;;  %v2490_v52 = vor.u32 %v2710_v51, %v2489_v50  ;;  %v2633_v50 = vld [vmem:[#allocation7 + $0x94] sm:$0xf]  ;;  %v2187_v51 = vld [vmem:[#allocation7 + $0x98] sm:$0xf0] }
  0x8d   :  { %v2134_v0 = vor.u32 %v2619_v59, %v2131_v60  ;;  %1516 = vmatpush.bf16.msrb.mxu1 %v2210_v6 }
  0x8e   :  { %1506 = vmatpush.bf16.msrb.mxu0 %v2114_v17  ;;  %v2386_v17 = vor.u32 %v2684_v13, %v2385_v11 }
  0x90   :  { %1534 = vmatpush.bf16.msrb.mxu2 %v2242_v9 }
  0x92   :  { %1555 = vmatpush.bf16.msra.mxu0 %v2426_v19  ;;  %v2123_v19 = vld [vmem:[#allocation7 + $0x18] sm:$0xf0] }
  0x93   :  { %v2126_v20 = vor.u32 %v2617_v18, %v2123_v19  ;;  %v2473_v18 = vld [vmem:[#allocation7 + $0x2d0] sm:$0xf]  ;;  %v2706_v19 = vld [vmem:[#allocation7 + $0x2d4] sm:$0xf0] }
  0x94   :  { %1583 = vmatpush.bf16.msra.mxu2 %v2174_v10  ;;  %v2330_v10 = vor.u32 %v2670_v8, %v2329_v7  ;;  %v2482_v8 = vor.u32 %v2708_v5, %v2481_v1  ;;  %v2291_v1 = vld [vmem:[#allocation7 + $0x168] sm:$0xf0] }
  0x96   :  { %1556 = vmatpush.bf16.msra.mxu0 %v2418_v30  ;;  %1545 = vmatpush.bf16.msrb.mxu3 %v2330_v10  ;;  %v2682_v30 = vld [vmem:[#allocation7 + $0x214] sm:$0xf0]  ;;  %v2219_v10 = vld [vmem:[#allocation7 + $0xd8] sm:$0xf0] }
  0x97   :  { %v2378_v14 = vor.u32 %v2682_v30, %v2377_v28  ;;  %v2465_v28 = vld [vmem:[#allocation7 + $0x2c0] sm:$0xf]  ;;  %v2704_v30 = vld [vmem:[#allocation7 + $0x2c4] sm:$0xf0] }
  0x98   :  { %1584 = vmatpush.bf16.msra.mxu2 %v2166_v24  ;;  %v2202_v24 = vor.u32 %v2638_v23, %v2201_v22  ;;  %v2474_v22 = vor.u32 %v2706_v19, %v2473_v18  ;;  %v2639_v23 = vld [vmem:[#allocation7 + $0xc4] sm:$0xf] }
  0x9a   :  { %1557 = vmatpush.bf16.msra.mxu0 %v2410_v40  ;;  %1517 = vmatpush.bf16.msrb.mxu1 %v2202_v24  ;;  %v2680_v40 = vld [vmem:[#allocation7 + $0x204] sm:$0xf0]  ;;  %v2211_v24 = vld [vmem:[#allocation7 + $0xc8] sm:$0xf0] }
  0x9b   :  { %1546 = vmatpush.bf16.msrb.mxu3 %v2322_v27  ;;  %v2370_v42 = vor.u32 %v2680_v40, %v2369_v39  ;;  %v2214_v26 = vor.u32 %v2639_v23, %v2211_v24  ;;  %v2457_v39 = vld [vmem:[#allocation7 + $0x2b0] sm:$0xf]  ;;  %v2702_v40 = vld [vmem:[#allocation7 + $0x2b4] sm:$0xf0]  ;;  %v2283_v23 = vld [vmem:[#allocation7 + $0x158] sm:$0xf0] }
  0x9c   :  { %1585 = vmatpush.bf16.msra.mxu2 %v2158_v32  ;;  %v2118_v32 = vor.u32 %v2615_v3, %v2115_v31  ;;  %v2466_v3 = vor.u32 %v2704_v30, %v2465_v28  ;;  %v2637_v31 = vld [vmem:[#allocation7 + $0xb4] sm:$0xf]  ;;  %v2433_v24 = vld [vmem:[#allocation7 + $0x280] sm:$0xf] }
  0x9e   :  { %1558 = vmatpush.bf16.msra.mxu0 %v2402_v45  ;;  %1518 = vmatpush.bf16.msrb.mxu1 %v2194_v35  ;;  %v2645_v45 = vld [vmem:[#allocation7 + $0xf4] sm:$0xf] }
  0x9f   :  { %1547 = vmatpush.bf16.msrb.mxu3 %v2314_v38  ;;  %v2693_v38 = vld [vmem:[#allocation7 + $0x274] sm:$0xf] }
  0xa0   :  { %1586 = vmatpush.bf16.msra.mxu2 %v2150_v55 }
  0xa2   :  { %1559 = vmatpush.bf16.msra.mxu0 %v2394_v58  ;;  %1519 = vmatpush.bf16.msrb.mxu1 %v2186_v44  ;;  %v2227_v58 = vld [vmem:[#allocation7 + $0xe8] sm:$0xf0]  ;;  %v2661_v44 = vld [vmem:[#allocation7 + $0x174] sm:$0xf] }
  0xa3   :  { %1548 = vmatpush.bf16.msrb.mxu3 %v2306_v54  ;;  %v2230_v60 = vor.u32 %v2643_v53, %v2227_v58 }
  0xa4   :  { %1587 = vmatpush.bf16.msra.mxu2 %v2142_v47  ;;  %v2238_v47 = vor.u32 %v2645_v45, %v2235_v62  ;;  %v2419_v62 = vld [vmem:[#allocation7 + $0x268] sm:$0xf0] }
  0xa6   :  { %1560 = vmatpush.bf16.msra.mxu0 %v2386_v17  ;;  %1520 = vmatpush.bf16.msrb.mxu1 %v2178_v12 }
  0xa7   :  { %1597 = vmatpush.bf16.msra.mxu3 %v2238_v47  ;;  %v2700_v47 = vld [vmem:[#allocation7 + $0x2a4] sm:$0xf0] }
  0xa8   :  { %1588 = vmatpush.bf16.msra.mxu2 %v2134_v0 }
  0xaa   :  { %1561 = vmatpush.bf16.msra.mxu0 %v2378_v14  ;;  %1569 = vmatpush.bf16.msra.mxu1 %v2490_v52  ;;  %v2190_v52 = vor.u32 %v2633_v50, %v2187_v51 }
  0xab   :  { %1598 = vmatpush.bf16.msra.mxu3 %v2230_v60  ;;  %v2302_v60 = vor.u32 %v2661_v44, %v2299_v4  ;;  %v2683_v4 = vld [vmem:[#allocation7 + $0x224] sm:$0xf] }
  0xac   :  { %1589 = vmatpush.bf16.msra.mxu2 %v2126_v20 }
  0xae   :  { %1562 = vmatpush.bf16.msra.mxu0 %v2370_v42  ;;  %1570 = vmatpush.bf16.msra.mxu1 %v2482_v8  ;;  %v2458_v42 = vor.u32 %v2702_v40, %v2457_v39  ;;  %v2689_v8 = vld [vmem:[#allocation7 + $0x254] sm:$0xf] }
  0xb0   :  { %1590 = vmatpush.bf16.msra.mxu2 %v2118_v32  ;;  %v2203_v32 = vld [vmem:[#allocation7 + $0xb8] sm:$0xf0] }
  0xb1   :  { %v722_v9 = vpop.f32.mrf.mxu0  ;;  %v2206_v36 = vor.u32 %v2637_v31, %v2203_v32  ;;  %v2275_v31 = vld [vmem:[#allocation7 + $0x148] sm:$0xf0] }
  0xb2   :  { %v736_v16 = vpop.f32.mrf.mxu1  ;;  %1571 = vmatpush.bf16.msra.mxu1 %v2474_v22 }
  0xb3   :  { %v737_v41 = vadd.f32 %v736_v16, %v722_v9  ;;  %v2641_v9 = vld [vmem:[#allocation7 + $0xd4] sm:$0xf] }
  0xb4   :  { %v2222_v16 = vor.u32 %v2641_v9, %v2219_v10  ;;  %v2441_v9 = vld [vmem:[#allocation7 + $0x290] sm:$0xf]  ;;  %v2698_v10 = vld [vmem:[#allocation7 + $0x294] sm:$0xf0] }
  0xb6   :  { %v750_v56 = vpop.f32.mrf.mxu2  ;;  %1599 = vmatpush.bf16.msra.mxu3 %v2222_v16  ;;  %1572 = vmatpush.bf16.msra.mxu1 %v2466_v3  ;;  %v2631_v16 = vld [vmem:[#allocation7 + $0x84] sm:$0xf] }
  0xb7   :  { %v751_v46 = vadd.f32 %v750_v56, %v737_v41  ;;  %v2427_v41 = vld [vmem:[#allocation7 + $0x278] sm:$0xf0]  ;;  %v2195_v56 = vld [vmem:[#allocation7 + $0xa8] sm:$0xf0]  ;;  %v2655_v3 = vld [vmem:[#allocation7 + $0x144] sm:$0xf] }
  0xb8   :  { %v2430_v45 = vor.u32 %v2693_v38, %v2427_v41  ;;  %v2278_v40 = vor.u32 %v2655_v3, %v2275_v31  ;;  %v2363_v3 = vld [vmem:[#allocation7 + $0x1f8] sm:$0xf0] }
  0xb9   :  { %v724_v55 = vpop.f32.mrf.mxu0  ;;  %v764_v48 = vpop.f32.mrf.mxu3 }
  0xba   :  { %v738_v21 = vpop.f32.mrf.mxu1  ;;  %v765_v59 = vadd.f32 %v764_v48, %v751_v46  ;;  %1600 = vmatpush.bf16.msra.mxu3 %v2214_v26  ;;  %1573 = vmatpush.bf16.msra.mxu1 %v2458_v42  ;;  %v2449_v46 = vld [vmem:[#allocation7 + $0x2a0] sm:$0xf]  ;;  %v2687_v26 = vld [vmem:[#allocation7 + $0x244] sm:$0xf] }
  0xbb   :  { %v739_v0 = vadd.f32 %v738_v21, %v724_v55  ;;  %v2635_v55 = vld [vmem:[#allocation7 + $0xa4] sm:$0xf]  ;;  %v2450_v12 = vor.u32 %v2700_v47, %v2449_v46  ;;  %v2259_v47 = vld [vmem:[#allocation7 + $0x128] sm:$0xf0] }
  0xbc   :  { %v2198_v21 = vor.u32 %v2635_v55, %v2195_v56  ;;  %v2653_v55 = vld [vmem:[#allocation7 + $0x134] sm:$0xf]  ;;  %v2267_v56 = vld [vmem:[#allocation7 + $0x138] sm:$0xf0]  ;;  %v2651_v46 = vld [vmem:[#allocation7 + $0x124] sm:$0xf] }
  0xbe   :  { %v752_v7 = vpop.f32.mrf.mxu2  ;;  %1601 = vmatpush.bf16.msra.mxu3 %v2206_v36  ;;  %1574 = vmatpush.bf16.msra.mxu1 %v2450_v12  ;;  %v2379_v12 = vld [vmem:[#allocation7 + $0x218] sm:$0xf0] }
  0xbf   :  { %v753_v17 = vadd.f32 %v752_v7, %v739_v0  ;;  %v2659_v0 = vld [vmem:[#allocation7 + $0x164] sm:$0xf]  ;;  %v2422_v7 = vor.u32 %v2691_v15, %v2419_v62  ;;  %v2387_v15 = vld [vmem:[#allocation7 + $0x228] sm:$0xf0] }
  0xc0   :  { %v2294_v19 = vor.u32 %v2659_v0, %v2291_v1  ;;  %v2390_v62 = vor.u32 %v2683_v4, %v2387_v15  ;;  %v2649_v0 = vld [vmem:[#allocation7 + $0x114] sm:$0xf]  ;;  %v2251_v1 = vld [vmem:[#allocation7 + $0x118] sm:$0xf0]  ;;  %v2703_v4 = vld [vmem:[#allocation7 + $0x2c4] sm:$0xf] }
  0xc1   :  { %v766_v20 = vpop.f32.mrf.mxu3  ;;  %v2467_v15 = vld [vmem:[#allocation7 + $0x2c8] sm:$0xf0] }
  0xc2   :  { %v767_v27 = vadd.f32 %v766_v20, %v753_v17  ;;  %1602 = vmatpush.bf16.msra.mxu3 %v2198_v21  ;;  %v2179_v17 = vld [vmem:[#allocation7 + $0x88] sm:$0xf0]  ;;  %v2657_v20 = vld [vmem:[#allocation7 + $0x154] sm:$0xf] }
  0xc3   :  { %v2182_v18 = vor.u32 %v2631_v16, %v2179_v17  ;;  %v2286_v30 = vor.u32 %v2657_v20, %v2283_v23  ;;  %v2243_v16 = vld [vmem:[#allocation7 + $0x108] sm:$0xf0] }
  0xc6   :  { %1603 = vmatpush.bf16.msra.mxu3 %v2190_v52 }
  0xca   :  { %1604 = vmatpush.bf16.msra.mxu3 %v2182_v18 }
  0xce   :  { %v778_v6 = vpop.f32.mrf.mxu0 }
  0xcf   :  { %v779_v11 = vadd.f32 %v778_v6, %v765_v59  ;;  %v792_v13 = vpop.f32.mrf.mxu1 }
  0xd1   :  { %v793_v25 = vadd.f32 %v792_v13, %v779_v11  ;;  %v2411_v11 = vld [vmem:[#allocation7 + $0x258] sm:$0xf0]  ;;  %v2442_v13 = vor.u32 %v2698_v10, %v2441_v9  ;;  %v2254_v9 = vor.u32 %v2649_v0, %v2251_v1 }
  0xd2   :  { %v2414_v22 = vor.u32 %v2689_v8, %v2411_v11 }
  0xd3   :  { %v885_v34 = vmul.f32 0.01, %v793_v25  ;;  %vm881_vm8 = vcmp.ge.f32.partialorder %v793_v25, 0.0  ;;  %1575 = vmatpush.bf16.msra.mxu1 %v2442_v13  ;;  %v2647_v13 = vld [vmem:[#allocation7 + $0x104] sm:$0xf] }
  0xd5   :  { %v2984_v63 = vsel %vm881_vm8, %v793_v25, %v885_v34  ;;  %v2696_v25 = vld [vmem:[#allocation7 + $0x284] sm:$0xf0] }
  0xd6   :  { %v780_v14 = vpop.f32.mrf.mxu0  ;;  %v893_v48 = vrot.slane %v2984_v63, 7  ;;  %v806_v59 = vpop.f32.mrf.mxu2  ;;  %v2434_v28 = vor.u32 %v2696_v25, %v2433_v24  ;;  %v905_v39 = vrot.slane %v2984_v63, 1  ;;  %v2709_v24 = vld [vmem:[#allocation7 + $0x2f4] sm:$0xf]  ;;  %v2491_v25 = vld [vmem:[#allocation7 + $0x2f8] sm:$0xf0] }
  0xd7   :  { %v781_v33 = vadd.f32 %v780_v14, %v767_v27  ;;  %v794_v35 = vpop.f32.mrf.mxu1  ;;  %v820_v5 = vpop.f32.mrf.mxu3  ;;  %v2403_v27 = vld [vmem:[#allocation7 + $0x248] sm:$0xf0] }
  0xd8   :  { %v2406_v14 = vor.u32 %v2687_v26, %v2403_v27  ;;  %1576 = vmatpush.bf16.msra.mxu1 %v2434_v28  ;;  %v821_v36 = vadd.f32 %v820_v5, %v806_v59  ;;  %v2679_v5 = vld [vmem:[#allocation7 + $0x204] sm:$0xf] }
  0xd9   :  { %v795_v37 = vadd.f32 %v794_v35, %v781_v33  ;;  %v2685_v33 = vld [vmem:[#allocation7 + $0x234] sm:$0xf]  ;;  %v2395_v35 = vld [vmem:[#allocation7 + $0x238] sm:$0xf0] }
  0xda   :  { %v2398_v42 = vor.u32 %v2685_v33, %v2395_v35  ;;  %v2707_v33 = vld [vmem:[#allocation7 + $0x2e4] sm:$0xf]  ;;  %v2483_v35 = vld [vmem:[#allocation7 + $0x2e8] sm:$0xf0] }
  0xdb   :  { %vm883_vm9 = vcmp.ge.f32.partialorder %v795_v37, 0.0  ;;  %v887_v43 = vmul.f32 0.01, %v795_v37 }
  0xdd   :  { %v2986_v54 = vsel %vm883_vm9, %v795_v37, %v887_v43 }
  0xde   :  { %v895_v49 = vrot.slane %v2986_v54, 7  ;;  %v2992_v2 = vpack.c.bf16 %v2986_v54, %v2984_v63  ;;  %v907_v32 = vrot.slane %v2986_v54, 1  ;;  %v808_v34 = vpop.f32.mrf.mxu2  ;;  %v2270_v63 = vor.u32 %v2653_v55, %v2267_v56  ;;  %v2705_v55 = vld [vmem:[#allocation7 + $0x2d4] sm:$0xf]  ;;  %v2475_v56 = vld [vmem:[#allocation7 + $0x2d8] sm:$0xf0] }
  0xdf   :  { %v822_v37 = vpop.f32.mrf.mxu3 }
  0xe0   :  { %v897_v53 = vsel %vm101_vm0, %v893_v48, %v895_v49  ;;  %v899_v58 = vsel %vm101_vm0, %v895_v49, %v893_v48  ;;  %1535 = vmatmul.bf16.vlgmr.msrb.gmra.mxu2 %v2992_v2  ;;  %v909_v43 = vsel %vm118_vm5, %v905_v39, %v907_v32  ;;  %v911_v21 = vsel %vm118_vm5, %v907_v32, %v905_v39  ;;  %v2681_v49 = vld [vmem:[#allocation7 + $0x214] sm:$0xf] }
  0xe1   :  { %1639 = vmatpush.bf16.msrb.mxu2 %v2430_v45  ;;  %v2496_v6 = vpack.c.bf16 %v897_v53, %v899_v58  ;;  %v2502_v45 = vpack.c.bf16 %v911_v21, %v909_v43  ;;  %v823_v50 = vadd.f32 %v822_v37, %v808_v34  ;;  %v2262_v58 = vor.u32 %v2651_v46, %v2259_v47  ;;  %v2673_v21 = vld [vmem:[#allocation7 + $0x1d4] sm:$0xf] }
  0xe2   :  { %v2478_v43 = vor.u32 %v2705_v55, %v2475_v56  ;;  %v2701_v47 = vld [vmem:[#allocation7 + $0x2b4] sm:$0xf] }
  0xe3   :  { %2497 = vmatmul.msk.bf16.vlgmr.msrb.gmra.mxu0 %vm2910_vm3, %v2496_v6 }
  0xe4   :  { %1611 = vmatpush.bf16.msrb.mxu0 %v2302_v60  ;;  %v2382_v60 = vor.u32 %v2681_v49, %v2379_v12 }
  0xe5   :  { %1640 = vmatpush.bf16.msrb.mxu2 %v2422_v7 }
  0xe8   :  { %1612 = vmatpush.bf16.msrb.mxu0 %v2294_v19 }
  0xe9   :  { %1641 = vmatpush.bf16.msrb.mxu2 %v2414_v22  ;;  %v2246_v22 = vor.u32 %v2647_v13, %v2243_v16  ;;  %v2315_v13 = vld [vmem:[#allocation7 + $0x198] sm:$0xf0]  ;;  %v2435_v16 = vld [vmem:[#allocation7 + $0x288] sm:$0xf0] }
  0xec   :  { %1613 = vmatpush.bf16.msrb.mxu0 %v2286_v30  ;;  %v2494_v30 = vor.u32 %v2709_v24, %v2491_v25 }
  0xed   :  { %1642 = vmatpush.bf16.msrb.mxu2 %v2406_v14  ;;  %v2677_v14 = vld [vmem:[#allocation7 + $0x1f4] sm:$0xf] }
  0xee   :  { %v834_v38 = vpop.f32.mrf.mxu0 }
  0xef   :  { %v835_v41 = vadd.f32 %v834_v38, %v821_v36  ;;  %v848_v44 = vpop.f32.mrf.mxu1  ;;  %v2366_v38 = vor.u32 %v2677_v14, %v2363_v3 }
  0xf0   :  { %2509 = vmatmul.msk.bf16.vlgmr.msra.gmra.mxu2 %vm2910_vm3, %v2496_v6  ;;  %1614 = vmatpush.bf16.msrb.mxu0 %v2278_v40  ;;  %v2371_v6 = vld [vmem:[#allocation7 + $0x208] sm:$0xf0]  ;;  %v2486_v40 = vor.u32 %v2707_v33, %v2483_v35  ;;  %v2720_v35 = vld [vmem:[#allocation2 + $0x10] sm:$0xff] }
  0xf1   :  { %v849_v54 = vadd.f32 %v848_v44, %v835_v41  ;;  %1643 = vmatpush.bf16.msrb.mxu2 %v2398_v42  ;;  %v2374_v11 = vor.u32 %v2679_v5, %v2371_v6  ;;  %v2675_v41 = vld [vmem:[#allocation7 + $0x1e4] sm:$0xf]  ;;  %v2355_v42 = vld [vmem:[#allocation7 + $0x1e8] sm:$0xf0]  ;;  %v2347_v44 = vld [vmem:[#allocation7 + $0x1d8] sm:$0xf0] }
  0xf2   :  { %v2667_v6 = vld [vmem:[#allocation7 + $0x1a4] sm:$0xf] }
  0xf3   :  { %2503 = vmatmul.msk.bf16.vlgmr.msra.gmra.mxu0 %vm2958_vm7, %v2502_v45 }
  0xf4   :  { %1615 = vmatpush.bf16.msrb.mxu0 %v2270_v63  ;;  %v2350_v63 = vor.u32 %v2673_v21, %v2347_v44 }
  0xf5   :  { %1644 = vmatpush.bf16.msrb.mxu2 %v2390_v62  ;;  %v2339_v62 = vld [vmem:[#allocation7 + $0x1c8] sm:$0xf0] }
  0xf6   :  { %v862_v48 = vpop.f32.mrf.mxu2  ;;  %v836_v53 = vpop.f32.mrf.mxu0 }
  0xf7   :  { %v863_v51 = vadd.f32 %v862_v48, %v849_v54  ;;  %v876_v52 = vpop.f32.mrf.mxu3  ;;  %v837_v59 = vadd.f32 %v836_v53, %v823_v50  ;;  %v850_v8 = vpop.f32.mrf.mxu1  ;;  %v2470_v54 = vor.u32 %v2703_v4, %v2467_v15  ;;  %v2459_v48 = vld [vmem:[#allocation7 + $0x2b8] sm:$0xf0] }
  0xf8   :  { %1616 = vmatpush.bf16.msrb.mxu0 %v2262_v58  ;;  %v2462_v50 = vor.u32 %v2701_v47, %v2459_v48 }
  0xf9   :  { %v877_v7 = vadd.f32 %v876_v52, %v863_v51  ;;  %v851_v10 = vadd.f32 %v850_v8, %v837_v59  ;;  %1645 = vmatpush.bf16.msrb.mxu2 %v2382_v60  ;;  %v2669_v51 = vld [vmem:[#allocation7 + $0x1b4] sm:$0xf]  ;;  %v2331_v52 = vld [vmem:[#allocation7 + $0x1b8] sm:$0xf0]  ;;  %v2699_v59 = vld [vmem:[#allocation7 + $0x2a4] sm:$0xf] }
  0xfa   :  { %v2451_v60 = vld [vmem:[#allocation7 + $0x2a8] sm:$0xf0]  ;;  %v2334_v0 = vor.u32 %v2669_v51, %v2331_v52  ;;  %v2697_v8 = vld [vmem:[#allocation7 + $0x294] sm:$0xf]  ;;  %v2722_v52 = vld [vmem:[#allocation2 + $0x18] sm:$0xff] }
  0xfb   :  { %v886_v18 = vmul.f32 0.01, %v877_v7  ;;  %vm882_vm10 = vcmp.ge.f32.partialorder %v877_v7, 0.0  ;;  %v2454_v5 = vor.u32 %v2699_v59, %v2451_v60 }
  0xfc   :  { %1617 = vmatpush.bf16.msrb.mxu0 %v2254_v9  ;;  %v2443_v9 = vld [vmem:[#allocation7 + $0x298] sm:$0xf0] }
  0xfd   :  { %1646 = vmatpush.bf16.msrb.mxu2 %v2374_v11  ;;  %v890_v26 = vsel %vm882_vm10, %v877_v7, %v886_v18  ;;  %v2323_v7 = vld [vmem:[#allocation7 + $0x1a8] sm:$0xf0]  ;;  %v2665_v11 = vld [vmem:[#allocation7 + $0x194] sm:$0xf]  ;;  %v2438_v18 = vor.u32 %v2695_v29, %v2435_v16 }
  0xfe   :  { %v864_v17 = vpop.f32.mrf.mxu2  ;;  %v894_v31 = vrot.slane %v890_v26, 7  ;;  %v906_v49 = vrot.slane %v890_v26, 1  ;;  %v2326_v57 = vor.u32 %v2667_v6, %v2323_v7 }
  0xff   :  { %v865_v19 = vadd.f32 %v864_v17, %v851_v10  ;;  %v878_v20 = vpop.f32.mrf.mxu3  ;;  %v2446_v10 = vor.u32 %v2697_v8, %v2443_v9  ;;  %v2318_v17 = vor.u32 %v2665_v11, %v2315_v13 }
 0x100   :  { %1618 = vmatpush.bf16.msrb.mxu0 %v2246_v22  ;;  %2515 = vmatmul.msk.bf16.vlgmr.msrb.gmra.mxu2 %vm2958_vm7, %v2502_v45  ;;  %v2671_v45 = vld [vmem:[#allocation7 + $0x1c4] sm:$0xf] }
 0x101   :  { %v879_v23 = vadd.f32 %v878_v20, %v865_v19  ;;  %v2342_v12 = vor.u32 %v2671_v45, %v2339_v62  ;;  %v2663_v19 = vld [vmem:[#allocation7 + $0x184] sm:$0xf]  ;;  %v2307_v20 = vld [vmem:[#allocation7 + $0x188] sm:$0xf0] }
 0x102   :  { %v2310_v22 = vor.u32 %v2663_v19, %v2307_v20 }
 0x103   :  { %vm884_vm11 = vcmp.ge.f32.partialorder %v879_v23, 0.0  ;;  %v888_v27 = vmul.f32 0.01, %v879_v23  ;;  %1619 = vmatmul.bf16.vlgmr.msrb.gmra.mxu0 %v2992_v2  ;;  %v2358_v2 = vor.u32 %v2675_v41, %v2355_v42 }
 0x105   :  { %v892_v28 = vsel %vm884_vm11, %v879_v23, %v888_v27  ;;  %v2719_v27 = vld [vmem:[#allocation2] sm:$0xff] }
 0x106   :  { %v896_v32 = vrot.slane %v892_v28, 7  ;;  %v3013_v34 = vpack.c.bf16 %v892_v28, %v890_v26  ;;  %v908_v46 = vrot.slane %v892_v28, 1 }
 0x108   :  { %v898_v36 = vsel %vm101_vm0, %v894_v31, %v896_v32  ;;  %v900_v37 = vsel %vm101_vm0, %v896_v32, %v894_v31  ;;  %1549 = vmatmul.bf16.vlgmr.msrb.gmra.mxu3 %v3013_v34  ;;  %v910_v53 = vsel %vm118_vm5, %v906_v49, %v908_v46  ;;  %v912_v58 = vsel %vm118_vm5, %v908_v46, %v906_v49 }
 0x109   :  { %1653 = vmatpush.bf16.msrb.mxu3 %v2494_v30  ;;  %v2499_v39 = vpack.c.bf16 %v898_v36, %v900_v37  ;;  %v2505_v1 = vpack.c.bf16 %v912_v58, %v910_v53 }
 0x10b   :  { %2500 = vmatmul.msk.bf16.vlgmr.msrb.gmra.mxu1 %vm2910_vm3, %v2499_v39 }
 0x10c   :  { %1625 = vmatpush.bf16.msrb.mxu1 %v2366_v38 }
 0x10d   :  { %1654 = vmatpush.bf16.msrb.mxu3 %v2486_v40 }
 0x110   :  { %1626 = vmatpush.bf16.msrb.mxu1 %v2358_v2 }
 0x111   :  { %1655 = vmatpush.bf16.msrb.mxu3 %v2478_v43 }
 0x114   :  { %1627 = vmatpush.bf16.msrb.mxu1 %v2350_v63  ;;  %v2721_v63 = vld [vmem:[#allocation2 + $0x8] sm:$0xff] }
 0x115   :  { %1656 = vmatpush.bf16.msrb.mxu3 %v2470_v54 }
 0x118   :  { %2512 = vmatmul.msk.bf16.vlgmr.msra.gmra.mxu3 %vm2910_vm3, %v2499_v39  ;;  %1628 = vmatpush.bf16.msrb.mxu1 %v2342_v12 }
 0x119   :  { %1657 = vmatpush.bf16.msrb.mxu3 %v2462_v50 }
 0x11b   :  { %2506 = vmatmul.msk.bf16.vlgmr.msra.gmra.mxu1 %vm2958_vm7, %v2505_v1 }
 0x11c   :  { %1629 = vmatpush.bf16.msrb.mxu1 %v2334_v0 }
 0x11d   :  { %1658 = vmatpush.bf16.msrb.mxu3 %v2454_v5 }
 0x120   :  { %1630 = vmatpush.bf16.msrb.mxu1 %v2326_v57 }
 0x121   :  { %1659 = vmatpush.bf16.msrb.mxu3 %v2446_v10 }
 0x124   :  { %1631 = vmatpush.bf16.msrb.mxu1 %v2318_v17 }
 0x125   :  { %1660 = vmatpush.bf16.msrb.mxu3 %v2438_v18 }
 0x128   :  { %1632 = vmatpush.bf16.msrb.mxu1 %v2310_v22  ;;  %2518 = vmatmul.msk.bf16.vlgmr.msrb.gmra.mxu3 %vm2958_vm7, %v2505_v1 }
 0x12b   :  { %1633 = vmatmul.bf16.vlgmr.msrb.gmra.mxu1 %v3013_v34 }
 0x160   :  { %v1508_v23 = vpop.f32.mrf.mxu0 }
 0x161   :  { %v1509_v28 = vadd.f32 %v2719_v27, %v1508_v23 }
 0x163   :  { %v1536_v24 = vpop.f32.mrf.mxu2 }
 0x168   :  { %v1510_v25 = vpop.f32.mrf.mxu0 }
 0x169   :  { %v1511_v36 = vadd.f32 %v2720_v35, %v1510_v25 }
 0x16b   :  { %v1538_v30 = vpop.f32.mrf.mxu2 }
 0x170   :  { %v1564_v32 = vpop.f32.mrf.mxu0 }
 0x173   :  { %v1592_v39 = vpop.f32.mrf.mxu2 }
 0x174   :  { %v1593_v54 = vadd.f32 %v2721_v63, %v1592_v39 }
 0x178   :  { %v1566_v55 = vpop.f32.mrf.mxu0 }
 0x17b   :  { %v1594_v44 = vpop.f32.mrf.mxu2 }
 0x17c   :  { %v1595_v53 = vadd.f32 %v2722_v52, %v1594_v44 }
 0x180   :  { %v1620_v48 = vpop.f32.mrf.mxu0 }
 0x183   :  { %v1648_v50 = vpop.f32.mrf.mxu2 }
 0x188   :  { %v1522_v26 = vpop.f32.mrf.mxu1  ;;  %v1622_v5 = vpop.f32.mrf.mxu0 }
 0x189   :  { %v1523_v14 = vadd.f32 %v1522_v26, %v1509_v28 }
 0x18b   :  { %v1550_v3 = vpop.f32.mrf.mxu3  ;;  %v1537_v31 = vadd.f32 %v1536_v24, %v1523_v14  ;;  %v1650_v10 = vpop.f32.mrf.mxu2 }
 0x18d   :  { %v1551_v37 = vadd.f32 %v1550_v3, %v1537_v31 }
 0x18f   :  { %v1565_v34 = vadd.f32 %v1564_v32, %v1551_v37 }
 0x190   :  { %v1524_v33 = vpop.f32.mrf.mxu1 }
 0x191   :  { %v1525_v38 = vadd.f32 %v1524_v33, %v1511_v36 }
 0x193   :  { %v1552_v61 = vpop.f32.mrf.mxu3  ;;  %v1539_v40 = vadd.f32 %v1538_v30, %v1525_v38 }
 0x195   :  { %v1553_v56 = vadd.f32 %v1552_v61, %v1539_v40 }
 0x197   :  { %v1567_v4 = vadd.f32 %v1566_v55, %v1553_v56 }
 0x198   :  { %v1578_v41 = vpop.f32.mrf.mxu1 }
 0x199   :  { %v1579_v42 = vadd.f32 %v1578_v41, %v1565_v34 }
 0x19b   :  { %vm1667_vm12 = vcmp.ge.f32.partialorder %v1579_v42, 0.0  ;;  %v1671_v2 = vmul.f32 0.01, %v1579_v42  ;;  %v1606_v43 = vpop.f32.mrf.mxu3 }
 0x19c   :  { %v1607_v62 = vadd.f32 %v1606_v43, %v1593_v54 }
 0x19d   :  { %v1675_v21 = vsel %vm1667_vm12, %v1579_v42, %v1671_v2 }
 0x19e   :  { %1679 = vst [vmem:[#allocation8] sm:$0xff] %v1675_v21  ;;  %v1621_v12 = vadd.f32 %v1620_v48, %v1607_v62 }
 0x1a0   :  { %v1580_v15 = vpop.f32.mrf.mxu1 }
 0x1a1   :  { %v1581_v45 = vadd.f32 %v1580_v15, %v1567_v4 }
 0x1a3   :  { %vm1669_vm13 = vcmp.ge.f32.partialorder %v1581_v45, 0.0  ;;  %v1673_v46 = vmul.f32 0.01, %v1581_v45  ;;  %v1608_v47 = vpop.f32.mrf.mxu3 }
 0x1a4   :  { %v1609_v59 = vadd.f32 %v1608_v47, %v1595_v53 }
 0x1a5   :  { %v1677_v49 = vsel %vm1669_vm13, %v1581_v45, %v1673_v46 }
 0x1a6   :  { %1681 = vst [vmem:[#allocation8 + $0x10] sm:$0xff] %v1677_v49  ;;  %v1623_v7 = vadd.f32 %v1622_v5, %v1609_v59 }
 0x1a8   :  { %v1634_v51 = vpop.f32.mrf.mxu1 }
 0x1a9   :  { %v1635_v58 = vadd.f32 %v1634_v51, %v1621_v12 }
 0x1ab   :  { %v1649_v60 = vadd.f32 %v1648_v50, %v1635_v58  ;;  %v1662_v0 = vpop.f32.mrf.mxu3 }
 0x1ad   :  { %v1663_v1 = vadd.f32 %v1662_v0, %v1649_v60 }
 0x1af   :  { %vm1668_vm14 = vcmp.ge.f32.partialorder %v1663_v1, 0.0  ;;  %v1672_v6 = vmul.f32 0.01, %v1663_v1 }
 0x1b0   :  { %v1636_v8 = vpop.f32.mrf.mxu1 }
 0x1b1   :  { %v1676_v9 = vsel %vm1668_vm14, %v1663_v1, %v1672_v6  ;;  %v1637_v57 = vadd.f32 %v1636_v8, %v1623_v7 }
 0x1b2   :  { %1680 = vst [vmem:[#allocation8 + $0x8] sm:$0xff] %v1676_v9 }
 0x1b3   :  { %v1651_v11 = vadd.f32 %v1650_v10, %v1637_v57  ;;  %v1664_v13 = vpop.f32.mrf.mxu3 }
 0x1b5   :  { %v1665_v29 = vadd.f32 %v1664_v13, %v1651_v11 }
 0x1b7   :  { %vm1670_vm15 = vcmp.ge.f32.partialorder %v1665_v29, 0.0  ;;  %v1674_v16 = vmul.f32 0.01, %v1665_v29 }
 0x1b9   :  { %v1678_v17 = vsel %vm1670_vm15, %v1665_v29, %v1674_v16 }
 0x1ba   :  { %1682 = vst [vmem:[#allocation8 + $0x18] sm:$0xff] %v1678_v17 }
 0x1bb   :  { %1695 = dma.vmem_to_hbm [thread:$0]  %s1688_s29, 512, %s1690_s5, [#allocation4], %s2829_s24, %s2829_s24, %s2830_s25  }
 0x1bc   :  { %2823 = dma.done.wait [#allocation4], 512  }
 0x1bd   :  { %2824 = vsyncadd [#allocation4], 4294966784 }
 0x1be   :  { %1700 = vsyncpa [#allocation3], 1 }
 0x1bf   :  { %1701 = vsyncpa [#allocation6], 1 }
 0x1c0   :  { %1702 = vsyncpa [#allocation4], 1 }

</bundles_post_ra>
